<compile_context>
chip_gen: v7x
topology: tpu7x:2x2x1
jax: 0.10.0
libtpu: 0.0.40
codegen_flags: <defaults>
</compile_context>

<pallas_src>
import math
import functools

import jax
import jax.numpy as jnp
from jax import lax
from jax.experimental import pallas as pl
from jax.experimental.pallas import tpu as pltpu

LN_EPS = 1e-5  # PyTorch LayerNorm default eps


def _gelu(x):
    # exact (erf-based) GELU, matching torch.nn.GELU()
    return 0.5 * x * (1.0 + lax.erf(x * (1.0 / math.sqrt(2.0))))


def _layernorm(x, gamma, beta):
    mu = jnp.mean(x, axis=-1, keepdims=True)
    var = jnp.mean((x - mu) ** 2, axis=-1, keepdims=True)
    return (x - mu) * lax.rsqrt(var + LN_EPS) * gamma + beta


# ----------------------------------------------------------------------------- kernel
def mpnn_kernel(hV_ref, hE_ref, mA_ref, mV_ref,
                w1v_ref, w1e_ref, v1_ref, b1_ref,
                w2_ref, b2_ref, w3_ref, b3_ref,
                g2_ref, be2_ref,
                win_ref, bin_ref, wout_ref, bout_ref,
                out_ref, *, inv_fin):
    mm_dtype = w2_ref.dtype            # matmul operand dtype (f32 or bf16)

    hV = hV_ref[...]                   # [tm, H]   streamed dtype
    hE = hE_ref[...]                   # [tm, K, E]
    tm, K, E = hE.shape
    H = hV.shape[-1]

    hV32 = hV.astype(jnp.float32)
    hE32 = hE.astype(jnp.float32)

    # ---- LayerNorm1 statistics over the *virtual* concat [h_V | h_E] (no concat) ----
    sV = jnp.sum(hV32, axis=-1, keepdims=True)              # [tm,1]
    qV = jnp.sum(hV32 * hV32, axis=-1, keepdims=True)       # [tm,1]
    sE = jnp.sum(hE32, axis=-1)                             # [tm,K]
    qE = jnp.sum(hE32 * hE32, axis=-1)                      # [tm,K]
    mu = (sV + sE) * inv_fin                                # [tm,K]
    var = jnp.maximum((qV + qE) * inv_fin - mu * mu, 0.0)
    rstd = lax.rsqrt(var + LN_EPS)                          # [tm,K]

    # ---- W1 applied to split halves.  h_V half is computed ONCE per node (tm rows). ----
    # ((x - mu)*rstd*g + beta) @ W1
    #   = rstd * ( (hV @ (g_V*W1_V) + hE @ (g_E*W1_E)) - mu * (g @ W1) ) + (b1 + beta @ W1)
    A = jnp.dot(hV.astype(mm_dtype), w1v_ref[...],
                preferred_element_type=jnp.float32)          # [tm, H]
    Bm = jnp.dot(hE.reshape(tm * K, E).astype(mm_dtype), w1e_ref[...],
                 preferred_element_type=jnp.float32).reshape(tm, K, H)
    v1 = v1_ref[...].astype(jnp.float32).reshape(1, 1, H)    # g1 @ W1
    b1 = b1_ref[...].astype(jnp.float32).reshape(1, 1, H)    # b1 + beta1 @ W1
    x1 = rstd[:, :, None] * (A[:, None, :] + Bm - mu[:, :, None] * v1) + b1
    h = _gelu(x1).reshape(tm * K, H)

    h = jnp.dot(h.astype(mm_dtype), w2_ref[...],
                preferred_element_type=jnp.float32) + b2_ref[...].astype(jnp.float32)
    h = _gelu(h).reshape(tm, K, H)

    # ---- masked neighbor-sum BEFORE W3 (W3 is linear; bias scaled by sum_k(mask)) ----
    mA = mA_ref[...].astype(jnp.float32)                     # [tm,K]
    s = jnp.sum(mA[:, :, None] * h, axis=1)                  # [tm,H]
    msum = jnp.sum(mA, axis=-1, keepdims=True)               # [tm,1]
    dh = jnp.dot(s.astype(mm_dtype), w3_ref[...],            # W3 already folded with 1/scale
                 preferred_element_type=jnp.float32) + msum * b3_ref[...].astype(jnp.float32)
    hV32 = hV32 + dh     # TODO(synk): dropout not implemented (identity / eval mode)

    # ---- norm2 + position-wise FFN ----
    z = _layernorm(hV32, g2_ref[...].astype(jnp.float32), be2_ref[...].astype(jnp.float32))
    f = _gelu(jnp.dot(z.astype(mm_dtype), win_ref[...],
                      preferred_element_type=jnp.float32) + bin_ref[...].astype(jnp.float32))
    dh = jnp.dot(f.astype(mm_dtype), wout_ref[...],
                 preferred_element_type=jnp.float32) + bout_ref[...].astype(jnp.float32)
    hV32 = hV32 + dh

    # ---- node mask ----
    hV32 = hV32 * mV_ref[...].astype(jnp.float32)
    out_ref[...] = hV32.astype(out_ref.dtype)


# ----------------------------------------------------------------------------- sizing
def _tpu_vmem_bytes():
    try:
        return int(pltpu.get_tpu_info().vmem_capacity_bytes)
    except Exception:
        return 64 << 20   # conservative default (v7x per-core VMEM)


def _choose_tm(M, K, H, E, act_bytes, vmem_bytes):
    """Largest node tile that comfortably fits VMEM (double-buffered I/O + f32 intermediates)."""
    stream = 2 * act_bytes * (H + K * E + K + 1) + 2 * 4 * H      # pipelined in/out buffers
    interm = 4 * K * (E + 3 * H) + 4 * 12 * H                     # rough f32 live intermediates
    per_row = stream + interm
    budget = int(vmem_bytes * 0.35)
    tm = max(8, min(512, (budget // max(per_row, 1)) // 8 * 8))
    m8 = -(-M // 8) * 8
    return min(tm, m8)


# ----------------------------------------------------------------------------- wrapper
def mpnn_layer_pallas(h_V, h_E, mask_V, mask_attend, params, *,
                      scale=30.0, tm=None, act_dtype=jnp.float32):
    B, N, H = h_V.shape
    K, E = h_E.shape[2], h_E.shape[3]
    M = B * N
    act_bytes = jnp.dtype(act_dtype).itemsize

    vmem_bytes = _tpu_vmem_bytes()
    if tm is None:
        tm = _choose_tm(M, K, H, E, act_bytes, vmem_bytes)
    assert tm % 8 == 0, "node tile must be a multiple of 8 (sublane constraint)"
    M_pad = -(-M // tm) * tm

    # ---- streamed activations (optionally bf16 to halve HBM traffic) ----
    hv = h_V.reshape(M, H).astype(act_dtype)
    he = h_E.reshape(M, K, E).astype(act_dtype)
    ma = mask_attend.reshape(M, K).astype(act_dtype)
    mv = mask_V.reshape(M, 1).astype(act_dtype)
    if M_pad > M:
        p = M_pad - M
        hv = jnp.pad(hv, ((0, p), (0, 0)))
        he = jnp.pad(he, ((0, p), (0, 0), (0, 0)))
        ma = jnp.pad(ma, ((0, p), (0, 0)))
        mv = jnp.pad(mv, ((0, p), (0, 0)))

    # ---- fold LayerNorm1 gamma/beta and 1/scale into the weights (one-time cost) ----
    f32 = jnp.float32
    W1 = params["W1"].astype(f32)                                  # [H+E, H]
    g1 = params["norm1_g"].reshape(-1).astype(f32)                 # [H+E]
    be1 = params["norm1_b"].reshape(-1).astype(f32)
    W1V = (g1[:H, None] * W1[:H]).astype(act_dtype)                # [H, H]
    W1E = (g1[H:, None] * W1[H:]).astype(act_dtype)                # [E, H]
    v1 = (g1 @ W1).reshape(1, H).astype(f32)                       # mu-correction vector
    b1_eff = (params["b1"].reshape(1, H).astype(f32) + (be1 @ W1).reshape(1, H)).astype(f32)

    W2 = params["W2"].astype(act_dtype)
    b2 = params["b2"].reshape(1, H).astype(f32)
    W3s = (params["W3"].astype(f32) / scale).astype(act_dtype)     # 1/scale folded in
    b3s = (params["b3"].reshape(1, H).astype(f32) / scale).astype(f32)
    g2 = params["norm2_g"].reshape(1, H).astype(f32)
    be2 = params["norm2_b"].reshape(1, H).astype(f32)
    Win = params["W_in"].astype(act_dtype)
    bin_ = params["b_in"].reshape(1, -1).astype(f32)
    Wout = params["W_out"].astype(act_dtype)
    bout = params["b_out"].reshape(1, H).astype(f32)

    param_list = [W1V, W1E, v1, b1_eff, W2, b2, W3s, b3s, g2, be2, Win, bin_, Wout, bout]

    def full_spec(p):
        nd = p.ndim
        return pl.BlockSpec(p.shape, lambda *_, nd=nd: (0,) * nd)

    in_specs = [
        pl.BlockSpec((tm, H), lambda i: (i, 0)),
        # hE is the dominant HBM stream; if profiling shows exposed DMA, use
        # pl.BlockSpec((tm, K, E), lambda i: (i, 0, 0), pipeline_mode=pl.Buffered(3))
        pl.BlockSpec((tm, K, E), lambda i: (i, 0, 0)),
        pl.BlockSpec((tm, K), lambda i: (i, 0)),
        pl.BlockSpec((tm, 1), lambda i: (i, 0)),
    ] + [full_spec(p) for p in param_list]
    out_specs = pl.BlockSpec((tm, H), lambda i: (i, 0))

    kernel = functools.partial(mpnn_kernel, inv_fin=1.0 / float(H + E))

    # advisory cost estimate for the XLA scheduler
    flops = 2 * M_pad * (H * H + K * E * H + K * H * H + H * H + 8 * H * H)
    transcendentals = M_pad * (2 * K * H + 4 * H)
    bytes_accessed = (M_pad * (H + K * E + K + 1) * act_bytes
                      + M_pad * H * act_bytes
                      + sum(int(p.size) * p.dtype.itemsize for p in param_list))

    out = pl.pallas_call(
        kernel,
        out_shape=jax.ShapeDtypeStruct((M_pad, H), act_dtype),
        grid_spec=pltpu.PrefetchScalarGridSpec(
            num_scalar_prefetch=0,
            grid=(M_pad // tm,),
            in_specs=in_specs,
            out_specs=out_specs,
        ),
        compiler_params=pltpu.CompilerParams(
            dimension_semantics=("parallel",),
            vmem_limit_bytes=int(vmem_bytes * 0.75),
        ),
        cost_estimate=pl.CostEstimate(
            flops=int(flops),
            transcendentals=int(transcendentals),
            bytes_accessed=int(bytes_accessed),
        ),
    )(hv, he, ma, mv, *param_list)
    return out[:M].reshape(B, N, H)


# ----------------------------------------------------------------------------- reference
def mpnn_layer_ref(h_V, h_E, mask_V, mask_attend, p, *, scale=30.0):
    # pure-JAX reference mirroring the PyTorch forward (eval mode)
    B, N, H = h_V.shape
    K = h_E.shape[2]
    hV_exp = jnp.broadcast_to(h_V[:, :, None, :], (B, N, K, H))
    hEV = jnp.concatenate([hV_exp, h_E], axis=-1)
    hEV = _layernorm(hEV, p["norm1_g"], p["norm1_b"])
    h = _gelu(hEV @ p["W1"] + p["b1"])
    h = _gelu(h @ p["W2"] + p["b2"])
    h = h @ p["W3"] + p["b3"]
    h = mask_attend[..., None] * h
    dh = jnp.sum(h, axis=-2) / scale
    hV = h_V + dh
    dh = _layernorm(hV, p["norm2_g"], p["norm2_b"])
    dh = _gelu(dh @ p["W_in"] + p["b_in"]) @ p["W_out"] + p["b_out"]
    hV = hV + dh
    hV = mask_V[..., None] * hV
    return hV


def init_params(key, num_hidden, num_in):
    H, E = num_hidden, num_in

    def linear(k, fan_in, fan_out):
        bound = 1.0 / math.sqrt(fan_in)
        kw, kb = jax.random.split(k)
        W = jax.random.uniform(kw, (fan_in, fan_out), jnp.float32, -bound, bound)
        b = jax.random.uniform(kb, (1, fan_out), jnp.float32, -bound, bound)
        return W, b

    ks = jax.random.split(key, 5)
    W1, b1 = linear(ks[0], H + E, H)
    W2, b2 = linear(ks[1], H, H)
    W3, b3 = linear(ks[2], H, H)
    W_in, b_in = linear(ks[3], H, 4 * H)
    W_out, b_out = linear(ks[4], 4 * H, H)
    return {
        "norm1_g": jnp.ones((1, H + E), jnp.float32),
        "norm1_b": jnp.zeros((1, H + E), jnp.float32),
        "W1": W1, "b1": b1, "W2": W2, "b2": b2, "W3": W3, "b3": b3,
        "norm2_g": jnp.ones((1, H), jnp.float32),
        "norm2_b": jnp.zeros((1, H), jnp.float32),
        "W_in": W_in, "b_in": b_in, "W_out": W_out, "b_out": b_out,
    }


if __name__ == "__main__":
    B, N, K, H, E = 2, 8, 4, 32, 32   # batch, nodes, neighbors, num_hidden, num_in
    SCALE = 30.0

    key = jax.random.PRNGKey(0)
    k_p, k_v, k_e, k_mv, k_ma = jax.random.split(key, 5)

    params = init_params(k_p, H, E)
    h_V = jax.random.normal(k_v, (B, N, H), jnp.float32)
    h_E = jax.random.normal(k_e, (B, N, K, E), jnp.float32)
    mask_V = (jax.random.uniform(k_mv, (B, N)) > 0.2).astype(jnp.float32)
    mask_attend = (jax.random.uniform(k_ma, (B, N, K)) > 0.2).astype(jnp.float32)

    ref = mpnn_layer_ref(h_V, h_E, mask_V, mask_attend, params, scale=SCALE)

    # f32 path: strict correctness check
    out = mpnn_layer_pallas(h_V, h_E, mask_V, mask_attend, params,
                            scale=SCALE, act_dtype=jnp.float32)
    out = jax.block_until_ready(out)
    assert out.shape == (B, N, H)
    assert bool(jnp.allclose(out, ref, atol=1e-4, rtol=1e-4)), "f32 mismatch vs reference"

    # bf16 streaming path: sanity check with loosened tolerance (bf16 operands)
    out_bf16 = mpnn_layer_pallas(h_V, h_E, mask_V, mask_attend, params,
                                 scale=SCALE, act_dtype=jnp.bfloat16)
    out_bf16 = jax.block_until_ready(out_bf16)
    assert bool(jnp.allclose(out_bf16.astype(jnp.float32), ref, atol=1e-1, rtol=5e-2)), \
        "bf16 mismatch vs reference"

    print("KERNEL_OK")
</pallas_src>

<mosaic_0001>
module attributes {stable_mosaic.version = 11 : i64} {
  func.func @mpnn_kernel(%arg0: i32, %arg1: memref<16x32xf32, #tpu.memory_space<vmem>>, %arg2: memref<16x4x32xf32, #tpu.memory_space<vmem>>, %arg3: memref<16x4xf32, #tpu.memory_space<vmem>>, %arg4: memref<16x1xf32, #tpu.memory_space<vmem>>, %arg5: memref<32x32xf32, #tpu.memory_space<vmem>>, %arg6: memref<32x32xf32, #tpu.memory_space<vmem>>, %arg7: memref<1x32xf32, #tpu.memory_space<vmem>>, %arg8: memref<1x32xf32, #tpu.memory_space<vmem>>, %arg9: memref<32x32xf32, #tpu.memory_space<vmem>>, %arg10: memref<1x32xf32, #tpu.memory_space<vmem>>, %arg11: memref<32x32xf32, #tpu.memory_space<vmem>>, %arg12: memref<1x32xf32, #tpu.memory_space<vmem>>, %arg13: memref<1x32xf32, #tpu.memory_space<vmem>>, %arg14: memref<1x32xf32, #tpu.memory_space<vmem>>, %arg15: memref<32x128xf32, #tpu.memory_space<vmem>>, %arg16: memref<1x128xf32, #tpu.memory_space<vmem>>, %arg17: memref<128x32xf32, #tpu.memory_space<vmem>>, %arg18: memref<1x32xf32, #tpu.memory_space<vmem>>, %arg19: memref<16x32xf32, #tpu.memory_space<vmem>>) attributes {dimension_semantics = [#tpu.dimension_semantics<parallel>], iteration_bounds = array<i64: 1>, scalar_prefetch = 0 : i64, scratch_operands = 0 : i64, tpu.core_type = #tpu.core_type<tc>, window_params = [{transform_indices = @transform_0, window_bounds = array<i64: 16, 32>}, {transform_indices = @transform_1, window_bounds = array<i64: 16, 4, 32>}, {transform_indices = @transform_2, window_bounds = array<i64: 16, 4>}, {transform_indices = @transform_3, window_bounds = array<i64: 16, 1>}, {pipeline_mode = #tpu.pipeline_mode<synchronous>, transform_indices = @transform_4, window_bounds = array<i64: 32, 32>}, {pipeline_mode = #tpu.pipeline_mode<synchronous>, transform_indices = @transform_5, window_bounds = array<i64: 32, 32>}, {pipeline_mode = #tpu.pipeline_mode<synchronous>, transform_indices = @transform_6, window_bounds = array<i64: 1, 32>}, {pipeline_mode = #tpu.pipeline_mode<synchronous>, transform_indices = @transform_7, window_bounds = array<i64: 1, 32>}, {pipeline_mode = #tpu.pipeline_mode<synchronous>, transform_indices = @transform_8, window_bounds = array<i64: 32, 32>}, {pipeline_mode = #tpu.pipeline_mode<synchronous>, transform_indices = @transform_9, window_bounds = array<i64: 1, 32>}, {pipeline_mode = #tpu.pipeline_mode<synchronous>, transform_indices = @transform_10, window_bounds = array<i64: 32, 32>}, {pipeline_mode = #tpu.pipeline_mode<synchronous>, transform_indices = @transform_11, window_bounds = array<i64: 1, 32>}, {pipeline_mode = #tpu.pipeline_mode<synchronous>, transform_indices = @transform_12, window_bounds = array<i64: 1, 32>}, {pipeline_mode = #tpu.pipeline_mode<synchronous>, transform_indices = @transform_13, window_bounds = array<i64: 1, 32>}, {pipeline_mode = #tpu.pipeline_mode<synchronous>, transform_indices = @transform_14, window_bounds = array<i64: 32, 128>}, {pipeline_mode = #tpu.pipeline_mode<synchronous>, transform_indices = @transform_15, window_bounds = array<i64: 1, 128>}, {pipeline_mode = #tpu.pipeline_mode<synchronous>, transform_indices = @transform_16, window_bounds = array<i64: 128, 32>}, {pipeline_mode = #tpu.pipeline_mode<synchronous>, transform_indices = @transform_17, window_bounds = array<i64: 1, 32>}, {transform_indices = @transform_18, window_bounds = array<i64: 16, 32>}]} {
    %c0 = arith.constant 0 : index
    %c0_0 = arith.constant 0 : index
    %0 = vector.load %arg1[%c0, %c0_0] : memref<16x32xf32, #tpu.memory_space<vmem>>, vector<16x32xf32>
    %c0_1 = arith.constant 0 : index
    %c0_2 = arith.constant 0 : index
    %c0_3 = arith.constant 0 : index
    %1 = vector.load %arg2[%c0_1, %c0_2, %c0_3] : memref<16x4x32xf32, #tpu.memory_space<vmem>>, vector<16x4x32xf32>
    %cst = arith.constant dense<0.000000e+00> : vector<16xf32>
    %2 = vector.multi_reduction <add>, %0, %cst [1] : vector<16x32xf32> to vector<16xf32>
    %3 = vector.shape_cast %2 : vector<16xf32> to vector<16x1xf32>
    %4 = arith.mulf %0, %0 : vector<16x32xf32>
    %cst_4 = arith.constant dense<0.000000e+00> : vector<16xf32>
    %5 = vector.multi_reduction <add>, %4, %cst_4 [1] : vector<16x32xf32> to vector<16xf32>
    %6 = vector.shape_cast %5 : vector<16xf32> to vector<16x1xf32>
    %cst_5 = arith.constant dense<0.000000e+00> : vector<16x4xf32>
    %7 = vector.multi_reduction <add>, %1, %cst_5 [2] : vector<16x4x32xf32> to vector<16x4xf32>
    %8 = arith.mulf %1, %1 : vector<16x4x32xf32>
    %cst_6 = arith.constant dense<0.000000e+00> : vector<16x4xf32>
    %9 = vector.multi_reduction <add>, %8, %cst_6 [2] : vector<16x4x32xf32> to vector<16x4xf32>
    %10 = vector.broadcast %3 : vector<16x1xf32> to vector<16x4xf32>
    %11 = arith.addf %10, %7 : vector<16x4xf32>
    %cst_7 = arith.constant 1.562500e-02 : f32
    %12 = vector.broadcast %cst_7 : f32 to vector<16x4xf32>
    %13 = arith.mulf %11, %12 : vector<16x4xf32>
    %14 = vector.broadcast %6 : vector<16x1xf32> to vector<16x4xf32>
    %15 = arith.addf %14, %9 : vector<16x4xf32>
    %cst_8 = arith.constant 1.562500e-02 : f32
    %16 = vector.broadcast %cst_8 : f32 to vector<16x4xf32>
    %17 = arith.mulf %15, %16 : vector<16x4xf32>
    %18 = arith.mulf %13, %13 : vector<16x4xf32>
    %19 = arith.subf %17, %18 : vector<16x4xf32>
    %cst_9 = arith.constant 0.000000e+00 : f32
    %20 = vector.broadcast %cst_9 : f32 to vector<16x4xf32>
    %21 = arith.maximumf %19, %20 : vector<16x4xf32>
    %cst_10 = arith.constant 9.99999974E-6 : f32
    %22 = vector.broadcast %cst_10 : f32 to vector<16x4xf32>
    %23 = arith.addf %21, %22 : vector<16x4xf32>
    %24 = math.rsqrt %23 : vector<16x4xf32>
    %c0_11 = arith.constant 0 : index
    %c0_12 = arith.constant 0 : index
    %25 = vector.load %arg5[%c0_11, %c0_12] : memref<32x32xf32, #tpu.memory_space<vmem>>, vector<32x32xf32>
    %cst_13 = arith.constant dense<0.000000e+00> : vector<16x32xf32>
    %26 = tpu.matmul %0, %25, %cst_13 {dimension_numbers = #tpu.dot_dimension_numbers<[1], [0], [0], [1], [0, 0, 1, 1], [], []>} : vector<16x32xf32>, vector<32x32xf32>, vector<16x32xf32> -> vector<16x32xf32>
    %27 = vector.shape_cast %1 : vector<16x4x32xf32> to vector<64x32xf32>
    %c0_14 = arith.constant 0 : index
    %c0_15 = arith.constant 0 : index
    %28 = vector.load %arg6[%c0_14, %c0_15] : memref<32x32xf32, #tpu.memory_space<vmem>>, vector<32x32xf32>
    %cst_16 = arith.constant dense<0.000000e+00> : vector<64x32xf32>
    %29 = tpu.matmul %27, %28, %cst_16 {dimension_numbers = #tpu.dot_dimension_numbers<[1], [0], [0], [1], [0, 0, 1, 1], [], []>} : vector<64x32xf32>, vector<32x32xf32>, vector<64x32xf32> -> vector<64x32xf32>
    %30 = vector.shape_cast %29 : vector<64x32xf32> to vector<16x4x32xf32>
    %c0_17 = arith.constant 0 : index
    %c0_18 = arith.constant 0 : index
    %31 = vector.load %arg7[%c0_17, %c0_18] : memref<1x32xf32, #tpu.memory_space<vmem>>, vector<1x32xf32>
    %32 = vector.shape_cast %31 : vector<1x32xf32> to vector<1x1x32xf32>
    %c0_19 = arith.constant 0 : index
    %c0_20 = arith.constant 0 : index
    %33 = vector.load %arg8[%c0_19, %c0_20] : memref<1x32xf32, #tpu.memory_space<vmem>>, vector<1x32xf32>
    %34 = vector.shape_cast %33 : vector<1x32xf32> to vector<1x1x32xf32>
    %35 = vector.shape_cast %24 : vector<16x4xf32> to vector<16x4x1xf32>
    %36 = vector.shape_cast %26 : vector<16x32xf32> to vector<16x1x32xf32>
    %37 = vector.broadcast %36 : vector<16x1x32xf32> to vector<16x4x32xf32>
    %38 = arith.addf %37, %30 : vector<16x4x32xf32>
    %39 = vector.shape_cast %13 : vector<16x4xf32> to vector<16x4x1xf32>
    %40 = vector.broadcast %39 : vector<16x4x1xf32> to vector<16x4x32xf32>
    %41 = vector.broadcast %32 : vector<1x1x32xf32> to vector<16x4x32xf32>
    %42 = arith.mulf %40, %41 : vector<16x4x32xf32>
    %43 = arith.subf %38, %42 : vector<16x4x32xf32>
    %44 = vector.broadcast %35 : vector<16x4x1xf32> to vector<16x4x32xf32>
    %45 = arith.mulf %44, %43 : vector<16x4x32xf32>
    %46 = vector.broadcast %34 : vector<1x1x32xf32> to vector<16x4x32xf32>
    %47 = arith.addf %45, %46 : vector<16x4x32xf32>
    %cst_21 = arith.constant 5.000000e-01 : f32
    %48 = vector.broadcast %cst_21 : f32 to vector<16x4x32xf32>
    %49 = arith.mulf %48, %47 : vector<16x4x32xf32>
    %cst_22 = arith.constant 0.707106769 : f32
    %50 = vector.broadcast %cst_22 : f32 to vector<16x4x32xf32>
    %51 = arith.mulf %47, %50 : vector<16x4x32xf32>
    %52 = math.erf %51 : vector<16x4x32xf32>
    %cst_23 = arith.constant 1.000000e+00 : f32
    %53 = vector.broadcast %cst_23 : f32 to vector<16x4x32xf32>
    %54 = arith.addf %53, %52 : vector<16x4x32xf32>
    %55 = arith.mulf %49, %54 : vector<16x4x32xf32>
    %56 = vector.shape_cast %55 : vector<16x4x32xf32> to vector<64x32xf32>
    %c0_24 = arith.constant 0 : index
    %c0_25 = arith.constant 0 : index
    %57 = vector.load %arg9[%c0_24, %c0_25] : memref<32x32xf32, #tpu.memory_space<vmem>>, vector<32x32xf32>
    %cst_26 = arith.constant dense<0.000000e+00> : vector<64x32xf32>
    %58 = tpu.matmul %56, %57, %cst_26 {dimension_numbers = #tpu.dot_dimension_numbers<[1], [0], [0], [1], [0, 0, 1, 1], [], []>} : vector<64x32xf32>, vector<32x32xf32>, vector<64x32xf32> -> vector<64x32xf32>
    %c0_27 = arith.constant 0 : index
    %c0_28 = arith.constant 0 : index
    %59 = vector.load %arg10[%c0_27, %c0_28] : memref<1x32xf32, #tpu.memory_space<vmem>>, vector<1x32xf32>
    %60 = vector.broadcast %59 : vector<1x32xf32> to vector<64x32xf32>
    %61 = arith.addf %58, %60 : vector<64x32xf32>
    %cst_29 = arith.constant 5.000000e-01 : f32
    %62 = vector.broadcast %cst_29 : f32 to vector<64x32xf32>
    %63 = arith.mulf %62, %61 : vector<64x32xf32>
    %cst_30 = arith.constant 0.707106769 : f32
    %64 = vector.broadcast %cst_30 : f32 to vector<64x32xf32>
    %65 = arith.mulf %61, %64 : vector<64x32xf32>
    %66 = math.erf %65 : vector<64x32xf32>
    %cst_31 = arith.constant 1.000000e+00 : f32
    %67 = vector.broadcast %cst_31 : f32 to vector<64x32xf32>
    %68 = arith.addf %67, %66 : vector<64x32xf32>
    %69 = arith.mulf %63, %68 : vector<64x32xf32>
    %70 = vector.shape_cast %69 : vector<64x32xf32> to vector<16x4x32xf32>
    %c0_32 = arith.constant 0 : index
    %c0_33 = arith.constant 0 : index
    %71 = vector.load %arg3[%c0_32, %c0_33] : memref<16x4xf32, #tpu.memory_space<vmem>>, vector<16x4xf32>
    %72 = vector.shape_cast %71 : vector<16x4xf32> to vector<16x4x1xf32>
    %73 = vector.broadcast %72 : vector<16x4x1xf32> to vector<16x4x32xf32>
    %74 = arith.mulf %73, %70 : vector<16x4x32xf32>
    %cst_34 = arith.constant dense<0.000000e+00> : vector<16x32xf32>
    %75 = vector.multi_reduction <add>, %74, %cst_34 [1] : vector<16x4x32xf32> to vector<16x32xf32>
    %cst_35 = arith.constant dense<0.000000e+00> : vector<16xf32>
    %76 = vector.multi_reduction <add>, %71, %cst_35 [1] : vector<16x4xf32> to vector<16xf32>
    %77 = vector.shape_cast %76 : vector<16xf32> to vector<16x1xf32>
    %c0_36 = arith.constant 0 : index
    %c0_37 = arith.constant 0 : index
    %78 = vector.load %arg11[%c0_36, %c0_37] : memref<32x32xf32, #tpu.memory_space<vmem>>, vector<32x32xf32>
    %cst_38 = arith.constant dense<0.000000e+00> : vector<16x32xf32>
    %79 = tpu.matmul %75, %78, %cst_38 {dimension_numbers = #tpu.dot_dimension_numbers<[1], [0], [0], [1], [0, 0, 1, 1], [], []>} : vector<16x32xf32>, vector<32x32xf32>, vector<16x32xf32> -> vector<16x32xf32>
    %c0_39 = arith.constant 0 : index
    %c0_40 = arith.constant 0 : index
    %80 = vector.load %arg12[%c0_39, %c0_40] : memref<1x32xf32, #tpu.memory_space<vmem>>, vector<1x32xf32>
    %81 = vector.broadcast %77 : vector<16x1xf32> to vector<16x32xf32>
    %82 = vector.broadcast %80 : vector<1x32xf32> to vector<16x32xf32>
    %83 = arith.mulf %81, %82 : vector<16x32xf32>
    %84 = arith.addf %79, %83 : vector<16x32xf32>
    %85 = arith.addf %0, %84 : vector<16x32xf32>
    %c0_41 = arith.constant 0 : index
    %c0_42 = arith.constant 0 : index
    %86 = vector.load %arg13[%c0_41, %c0_42] : memref<1x32xf32, #tpu.memory_space<vmem>>, vector<1x32xf32>
    %c0_43 = arith.constant 0 : index
    %c0_44 = arith.constant 0 : index
    %87 = vector.load %arg14[%c0_43, %c0_44] : memref<1x32xf32, #tpu.memory_space<vmem>>, vector<1x32xf32>
    %cst_45 = arith.constant dense<0.000000e+00> : vector<16xf32>
    %88 = vector.multi_reduction <add>, %85, %cst_45 [1] : vector<16x32xf32> to vector<16xf32>
    %89 = vector.shape_cast %88 : vector<16xf32> to vector<16x1xf32>
    %cst_46 = arith.constant 3.200000e+01 : f32
    %90 = vector.broadcast %cst_46 : f32 to vector<16x1xf32>
    %91 = arith.divf %89, %90 : vector<16x1xf32>
    %92 = vector.broadcast %91 : vector<16x1xf32> to vector<16x32xf32>
    %93 = arith.subf %85, %92 : vector<16x32xf32>
    %94 = arith.mulf %93, %93 : vector<16x32xf32>
    %cst_47 = arith.constant dense<0.000000e+00> : vector<16xf32>
    %95 = vector.multi_reduction <add>, %94, %cst_47 [1] : vector<16x32xf32> to vector<16xf32>
    %96 = vector.shape_cast %95 : vector<16xf32> to vector<16x1xf32>
    %cst_48 = arith.constant 3.200000e+01 : f32
    %97 = vector.broadcast %cst_48 : f32 to vector<16x1xf32>
    %98 = arith.divf %96, %97 : vector<16x1xf32>
    %99 = vector.broadcast %91 : vector<16x1xf32> to vector<16x32xf32>
    %100 = arith.subf %85, %99 : vector<16x32xf32>
    %cst_49 = arith.constant 9.99999974E-6 : f32
    %101 = vector.broadcast %cst_49 : f32 to vector<16x1xf32>
    %102 = arith.addf %98, %101 : vector<16x1xf32>
    %103 = math.rsqrt %102 : vector<16x1xf32>
    %104 = vector.broadcast %103 : vector<16x1xf32> to vector<16x32xf32>
    %105 = arith.mulf %100, %104 : vector<16x32xf32>
    %106 = vector.broadcast %86 : vector<1x32xf32> to vector<16x32xf32>
    %107 = arith.mulf %105, %106 : vector<16x32xf32>
    %108 = vector.broadcast %87 : vector<1x32xf32> to vector<16x32xf32>
    %109 = arith.addf %107, %108 : vector<16x32xf32>
    %c0_50 = arith.constant 0 : index
    %c0_51 = arith.constant 0 : index
    %110 = vector.load %arg15[%c0_50, %c0_51] : memref<32x128xf32, #tpu.memory_space<vmem>>, vector<32x128xf32>
    %cst_52 = arith.constant dense<0.000000e+00> : vector<16x128xf32>
    %111 = tpu.matmul %109, %110, %cst_52 {dimension_numbers = #tpu.dot_dimension_numbers<[1], [0], [0], [1], [0, 0, 1, 1], [], []>} : vector<16x32xf32>, vector<32x128xf32>, vector<16x128xf32> -> vector<16x128xf32>
    %c0_53 = arith.constant 0 : index
    %c0_54 = arith.constant 0 : index
    %112 = vector.load %arg16[%c0_53, %c0_54] : memref<1x128xf32, #tpu.memory_space<vmem>>, vector<1x128xf32>
    %113 = vector.broadcast %112 : vector<1x128xf32> to vector<16x128xf32>
    %114 = arith.addf %111, %113 : vector<16x128xf32>
    %cst_55 = arith.constant 5.000000e-01 : f32
    %115 = vector.broadcast %cst_55 : f32 to vector<16x128xf32>
    %116 = arith.mulf %115, %114 : vector<16x128xf32>
    %cst_56 = arith.constant 0.707106769 : f32
    %117 = vector.broadcast %cst_56 : f32 to vector<16x128xf32>
    %118 = arith.mulf %114, %117 : vector<16x128xf32>
    %119 = math.erf %118 : vector<16x128xf32>
    %cst_57 = arith.constant 1.000000e+00 : f32
    %120 = vector.broadcast %cst_57 : f32 to vector<16x128xf32>
    %121 = arith.addf %120, %119 : vector<16x128xf32>
    %122 = arith.mulf %116, %121 : vector<16x128xf32>
    %c0_58 = arith.constant 0 : index
    %c0_59 = arith.constant 0 : index
    %123 = vector.load %arg17[%c0_58, %c0_59] : memref<128x32xf32, #tpu.memory_space<vmem>>, vector<128x32xf32>
    %cst_60 = arith.constant dense<0.000000e+00> : vector<16x32xf32>
    %124 = tpu.matmul %122, %123, %cst_60 {dimension_numbers = #tpu.dot_dimension_numbers<[1], [0], [0], [1], [0, 0, 1, 1], [], []>} : vector<16x128xf32>, vector<128x32xf32>, vector<16x32xf32> -> vector<16x32xf32>
    %c0_61 = arith.constant 0 : index
    %c0_62 = arith.constant 0 : index
    %125 = vector.load %arg18[%c0_61, %c0_62] : memref<1x32xf32, #tpu.memory_space<vmem>>, vector<1x32xf32>
    %126 = vector.broadcast %125 : vector<1x32xf32> to vector<16x32xf32>
    %127 = arith.addf %124, %126 : vector<16x32xf32>
    %128 = arith.addf %85, %127 : vector<16x32xf32>
    %c0_63 = arith.constant 0 : index
    %c0_64 = arith.constant 0 : index
    %129 = vector.load %arg4[%c0_63, %c0_64] : memref<16x1xf32, #tpu.memory_space<vmem>>, vector<16x1xf32>
    %130 = vector.broadcast %129 : vector<16x1xf32> to vector<16x32xf32>
    %131 = arith.mulf %128, %130 : vector<16x32xf32>
    %c0_65 = arith.constant 0 : index
    %c0_66 = arith.constant 0 : index
    %132 = vector.load %arg19[%c0_65, %c0_66] : memref<16x32xf32, #tpu.memory_space<vmem>>, vector<16x32xf32>
    tpu.vector_store %arg19[%c0_65, %c0_66], %131 {strides = array<i32>} : memref<16x32xf32, #tpu.memory_space<vmem>>, vector<16x32xf32>,
    return
  }
  func.func @transform_0(%arg0: i32) -> (i32, i32) {
    %c0_i32 = arith.constant 0 : i32
    %c0_i32_0 = arith.constant 0 : i32
    return %arg0, %c0_i32 : i32, i32
  }
  func.func @transform_1(%arg0: i32) -> (i32, i32, i32) {
    %c0_i32 = arith.constant 0 : i32
    %c0_i32_0 = arith.constant 0 : i32
    %c0_i32_1 = arith.constant 0 : i32
    return %arg0, %c0_i32, %c0_i32_0 : i32, i32, i32
  }
  func.func @transform_2(%arg0: i32) -> (i32, i32) {
    %c0_i32 = arith.constant 0 : i32
    %c0_i32_0 = arith.constant 0 : i32
    return %arg0, %c0_i32 : i32, i32
  }
  func.func @transform_3(%arg0: i32) -> (i32, i32) {
    %c0_i32 = arith.constant 0 : i32
    %c0_i32_0 = arith.constant 0 : i32
    return %arg0, %c0_i32 : i32, i32
  }
  func.func @transform_4(%arg0: i32) -> (i32, i32) {
    %c0_i32 = arith.constant 0 : i32
    %c0_i32_0 = arith.constant 0 : i32
    %c0_i32_1 = arith.constant 0 : i32
    return %c0_i32, %c0_i32_0 : i32, i32
  }
  func.func @transform_5(%arg0: i32) -> (i32, i32) {
    %c0_i32 = arith.constant 0 : i32
    %c0_i32_0 = arith.constant 0 : i32
    %c0_i32_1 = arith.constant 0 : i32
    return %c0_i32, %c0_i32_0 : i32, i32
  }
  func.func @transform_6(%arg0: i32) -> (i32, i32) {
    %c0_i32 = arith.constant 0 : i32
    %c0_i32_0 = arith.constant 0 : i32
    %c0_i32_1 = arith.constant 0 : i32
    return %c0_i32, %c0_i32_0 : i32, i32
  }
  func.func @transform_7(%arg0: i32) -> (i32, i32) {
    %c0_i32 = arith.constant 0 : i32
    %c0_i32_0 = arith.constant 0 : i32
    %c0_i32_1 = arith.constant 0 : i32
    return %c0_i32, %c0_i32_0 : i32, i32
  }
  func.func @transform_8(%arg0: i32) -> (i32, i32) {
    %c0_i32 = arith.constant 0 : i32
    %c0_i32_0 = arith.constant 0 : i32
    %c0_i32_1 = arith.constant 0 : i32
    return %c0_i32, %c0_i32_0 : i32, i32
  }
  func.func @transform_9(%arg0: i32) -> (i32, i32) {
    %c0_i32 = arith.constant 0 : i32
    %c0_i32_0 = arith.constant 0 : i32
    %c0_i32_1 = arith.constant 0 : i32
    return %c0_i32, %c0_i32_0 : i32, i32
  }
  func.func @transform_10(%arg0: i32) -> (i32, i32) {
    %c0_i32 = arith.constant 0 : i32
    %c0_i32_0 = arith.constant 0 : i32
    %c0_i32_1 = arith.constant 0 : i32
    return %c0_i32, %c0_i32_0 : i32, i32
  }
  func.func @transform_11(%arg0: i32) -> (i32, i32) {
    %c0_i32 = arith.constant 0 : i32
    %c0_i32_0 = arith.constant 0 : i32
    %c0_i32_1 = arith.constant 0 : i32
    return %c0_i32, %c0_i32_0 : i32, i32
  }
  func.func @transform_12(%arg0: i32) -> (i32, i32) {
    %c0_i32 = arith.constant 0 : i32
    %c0_i32_0 = arith.constant 0 : i32
    %c0_i32_1 = arith.constant 0 : i32
    return %c0_i32, %c0_i32_0 : i32, i32
  }
  func.func @transform_13(%arg0: i32) -> (i32, i32) {
    %c0_i32 = arith.constant 0 : i32
    %c0_i32_0 = arith.constant 0 : i32
    %c0_i32_1 = arith.constant 0 : i32
    return %c0_i32, %c0_i32_0 : i32, i32
  }
  func.func @transform_14(%arg0: i32) -> (i32, i32) {
    %c0_i32 = arith.constant 0 : i32
    %c0_i32_0 = arith.constant 0 : i32
    %c0_i32_1 = arith.constant 0 : i32
    return %c0_i32, %c0_i32_0 : i32, i32
  }
  func.func @transform_15(%arg0: i32) -> (i32, i32) {
    %c0_i32 = arith.constant 0 : i32
    %c0_i32_0 = arith.constant 0 : i32
    %c0_i32_1 = arith.constant 0 : i32
    return %c0_i32, %c0_i32_0 : i32, i32
  }
  func.func @transform_16(%arg0: i32) -> (i32, i32) {
    %c0_i32 = arith.constant 0 : i32
    %c0_i32_0 = arith.constant 0 : i32
    %c0_i32_1 = arith.constant 0 : i32
    return %c0_i32, %c0_i32_0 : i32, i32
  }
  func.func @transform_17(%arg0: i32) -> (i32, i32) {
    %c0_i32 = arith.constant 0 : i32
    %c0_i32_0 = arith.constant 0 : i32
    %c0_i32_1 = arith.constant 0 : i32
    return %c0_i32, %c0_i32_0 : i32, i32
  }
  func.func @transform_18(%arg0: i32) -> (i32, i32) {
    %c0_i32 = arith.constant 0 : i32
    %c0_i32_0 = arith.constant 0 : i32
    return %arg0, %c0_i32 : i32, i32
  }
}

</mosaic_0001>

<bundles_post_ra>
// kernel: tpu_custom_call.1
= control target key start
LH: loop header
LB: loop body
LE: loop exit
PB: predicated region body
PF: predicated region fallthrough
CT: control target
= control target key end

     0   :  { %s3452_s0 = inlined_call_operand.hbm [shape: f32[16,32], index: 0, kind: input, shape index: {}]   ;;  %s3453_s1 = inlined_call_operand.vmem [shape: f32[16,4,32], index: 1, kind: input, shape index: {}]   ;;  %s3454_s2 = inlined_call_operand.vmem [shape: f32[16,4], index: 2, kind: input, shape index: {}]   ;;  %s3455_s3 = inlined_call_operand.vmem [shape: f32[16,1], index: 3, kind: input, shape index: {}]   ;;  %s3456_s4 = inlined_call_operand.vmem [shape: f32[32,32], index: 4, kind: input, shape index: {}]   ;;  %s3457_s5 = inlined_call_operand.vmem [shape: f32[32,32], index: 5, kind: input, shape index: {}]   ;;  %s3458_s6 = inlined_call_operand.vmem [shape: f32[1,32], index: 6, kind: input, shape index: {}]   ;;  %s3459_s7 = inlined_call_operand.vmem [shape: f32[1,32], index: 7, kind: input, shape index: {}]   ;;  %s3460_s8 = inlined_call_operand.vmem [shape: f32[32,32], index: 8, kind: input, shape index: {}]   ;;  %s3461_s9 = inlined_call_operand.vmem [shape: f32[1,32], index: 9, kind: input, shape index: {}]   ;;  %s3462_s10 = inlined_call_operand.vmem [shape: f32[32,32], index: 10, kind: input, shape index: {}]   ;;  %s3463_s11 = inlined_call_operand.vmem [shape: f32[1,32], index: 11, kind: input, shape index: {}]   ;;  %s3464_s12 = inlined_call_operand.vmem [shape: f32[1,32], index: 12, kind: input, shape index: {}]   ;;  %s3465_s13 = inlined_call_operand.vmem [shape: f32[1,32], index: 13, kind: input, shape index: {}]   ;;  %s3466_s14 = inlined_call_operand.hbm [shape: f32[32,128], index: 14, kind: input, shape index: {}]   ;;  %s3467_s15 = inlined_call_operand.vmem [shape: f32[1,128], index: 15, kind: input, shape index: {}]   ;;  %s3468_s16 = inlined_call_operand.vmem [shape: f32[128,32], index: 16, kind: input, shape index: {}]   ;;  %s3469_s17 = inlined_call_operand.vmem [shape: f32[1,32], index: 17, kind: input, shape index: {}]   ;;  %s3470_s18 = inlined_call_operand.hbm [shape: f32[16,32], index: 18, kind: output, shape index: {}]  }
   0x1   :  { %3475 = sst [smem:[#allocation11_spill]] %s3452_s0 }
   0x2   :  { %3476 = sst [smem:[#allocation12_spill]] %s3453_s1 }
   0x3   :  { %3477 = sst [smem:[#allocation13_spill]] %s3454_s2 }
   0x4   :  { %3478 = sst [smem:[#allocation14_spill]] %s3470_s18 }
   0x5   :  { %23 = vsyncpa [#allocation3], 0 }
   0x6   :  { %24 = vsyncpa [#allocation6], 0 }
   0x7   :  { %25 = vsyncpa [#allocation4], 0  ;;  %s2584_s27 = smov [#allocation2]   ;;  %s3479_s0 = sld [smem:[#allocation11_spill]] }
   0x8   :  { %s31_s28 = sshll.u32 %s2584_s27, 4  ;;  %s32_s28 = int_to_ptr.vmem [resolvable:$true] %s31_s28 }
   0xd   :  { %s2512_s19 = scalar_lea.hbm %s3479_s0, 256 }
   0xe   :  { %p2513_p0 = scmp.ne.s32.totalorder %s3479_s0, %s2512_s19  ;;  %p2516_p1 = scmp.lt.u32.totalorder %s2512_s19, %s3479_s0 }
  0x10   :  { %p2518_p2 = pnand %p2516_p1, %p2513_p0 }
  0x12   :  { %2521 = shalt.err (!%p2518_p2)
}
  0x13   :  { %s2522_s2 = scalar_lea.vmem %s32_s28, 256  ;;  %p2527_p4 = scmp.lt.s32.totalorder %s32_s28, %s32_s28 }
  0x14   :  { %p2523_p3 = scmp.ne.s32.totalorder %s32_s28, %s2522_s2  ;;  %p2528_p5 = scmp.lt.s32.totalorder %s2522_s2, %s2522_s2 }
  0x16   :  { %p2529_p6 = por %p2528_p5, %p2527_p4 }
  0x18   :  { %p2530_p7 = pnand %p2529_p6, %p2523_p3 }
  0x1a   :  { %2533 = shalt.err (!%p2530_p7)
}
  0x1b   :  { %s2585_s23 = smov 128   ;;  %s2586_s24 = smov 8  }
  0x1c   :  { %37 = dma.hbm_to_vmem [thread:$0]  %s3479_s0, 256, %s32_s28, [#allocation3], %s2585_s23, %s2585_s23, %s2586_s24  }
  0x1d   :  { %s2587_s27 = smov [#allocation5]   ;;  %s2534_s1 = scalar_lea.hbm %s3466_s14, 512 }
  0x1e   :  { %s69_s29 = sshll.u32 %s2587_s27, 4  ;;  %p2535_p8 = scmp.ne.s32.totalorder %s3466_s14, %s2534_s1  ;;  %s70_s29 = int_to_ptr.vmem [resolvable:$true] %s69_s29 }
  0x1f   :  { %p2538_p9 = scmp.lt.u32.totalorder %s2534_s1, %s3466_s14 }
  0x21   :  { %p2540_p10 = pnand %p2538_p9, %p2535_p8 }
  0x23   :  { %2543 = shalt.err (!%p2540_p10)
}
  0x24   :  { %s2544_s18 = scalar_lea.vmem %s70_s29, 512  ;;  %p2549_p12 = scmp.lt.s32.totalorder %s70_s29, %s70_s29 }
  0x25   :  { %p2545_p11 = scmp.ne.s32.totalorder %s70_s29, %s2544_s18  ;;  %p2550_p13 = scmp.lt.s32.totalorder %s2544_s18, %s2544_s18 }
  0x27   :  { %p2551_p0 = por %p2550_p13, %p2549_p12 }
  0x29   :  { %p2552_p1 = pnand %p2551_p0, %p2545_p11 }
  0x2b   :  { %2555 = shalt.err (!%p2552_p1)
}
  0x2c   :  { %75 = dma.hbm_to_vmem [thread:$0]  %s3466_s14, 512, %s70_s29, [#allocation6], %s2585_s23, %s2585_s23, %s2586_s24  }
  0x2d   :  { %2578 = dma.done.wait [#allocation3], 256  }
  0x2e   :  { %2579 = vsyncadd [#allocation3], 4294967040 }
  0x2f   :  { %2580 = dma.done.wait [#allocation6], 512  }
  0x30   :  { %2581 = vsyncadd [#allocation6], 4294966784  ;;  %vm121_vm0 = vcmask 257024   ;;  %s3480_s27 = sld [smem:[#allocation12_spill]]  ;;  %v2735_v6 = vld [vmem:[#allocation2] sm:$0xff]  ;;  %vm106_vm1 = vcmask 261120  }
  0x31   :  { %2261 = vmatprep.mubr.msk.f32.mxu0 %vm106_vm1, %v2735_v6  ;;  %v453_v19 = vld [vmem:[%s3456_s4] sm:$0xff]  ;;  %v454_v20 = vld [vmem:[%s3456_s4 + $0x8] sm:$0xff]  ;;  %v455_v21 = vld [vmem:[%s3456_s4 + $0x10] sm:$0xff]  ;;  %vm316_vm2 = vcmask 1041409   ;;  %vm318_vm3 = vcmask 1042434   ;;  %vm320_vm4 = vcmask 1043459  }
  0x32   :  { %v456_v22 = vld [vmem:[%s3456_s4 + $0x18] sm:$0xff]  ;;  %v538_v23 = vld [vmem:[%s3457_s5] sm:$0xff]  ;;  %v539_v24 = vld [vmem:[%s3457_s5 + $0x8] sm:$0xff]  ;;  %v2361_v30 = vpack.c.bf16 %v454_v20, %v453_v19  ;;  %vm322_vm5 = vcmask 1044484   ;;  %vm324_vm6 = vcmask 1045509   ;;  %vm326_vm7 = vcmask 1046534  }
  0x33   :  { %v540_v25 = vld [vmem:[%s3457_s5 + $0x10] sm:$0xff]  ;;  %v541_v26 = vld [vmem:[%s3457_s5 + $0x18] sm:$0xff]  ;;  %v2365_v32 = vpack.c.bf16 %v456_v22, %v455_v21  ;;  %v2369_v33 = vpack.c.bf16 %v539_v24, %v538_v23  ;;  %v2798_v46 = vld [vmem:[#allocation2 + $0x8] sm:$0xff]  ;;  %vm328_vm8 = vcmask 1047559   ;;  %s3481_s22 = sld [smem:[#allocation13_spill]]  ;;  %vm1751_vm9 = vcmask 31744  }
  0x34   :  { %2362 = vmatprep.subr.bf16.mxu0 %v2361_v30  ;;  %v2373_v34 = vpack.c.bf16 %v541_v26, %v540_v25  ;;  %v114_v25 = vmul.f32 %v2798_v46, %v2798_v46  ;;  %s2590_s30 = smov [#allocation7]  }
  0x35   :  { %2364 = vmatpush3.bf16.msra.mxu0 %v2361_v30  ;;  %2370 = vmatprep.subr.bf16.mxu1 %v2369_v33  ;;  %s2150_s19 = sshll.u32 %s2590_s30, 4  ;;  %s2151_s19 = int_to_ptr.vmem [resolvable:$true] %s2150_s19 }
  0x36   :  { %v2719_v0 = vld [vmem:[%s3480_s27 + $0x8] sm:$0xf]  ;;  %v90_v1 = vld [vmem:[%s3480_s27] sm:$0xf]  ;;  %v2727_v2 = vld [vmem:[%s3480_s27 + $0xc] sm:$0xf]  ;;  %2366 = vmatprep.subr.bf16.mxu0 %v2365_v32  ;;  %2372 = vmatpush3.bf16.msra.mxu1 %v2369_v33  ;;  %p2561_p3 = scmp.lt.s32.totalorder %s2151_s19, %s2151_s19 }
  0x37   :  { %v128_v3 = vsel %vm121_vm0, %v2719_v0, 0.0  ;;  %v122_v4 = vsel %vm121_vm0, %v90_v1, 0.0  ;;  %v91_v5 = vld [vmem:[%s3480_s27 + $0x4] sm:$0xf]  ;;  %v131_v7 = vsel %vm121_vm0, %v2727_v2, 0.0  ;;  %v170_v10 = vmul.f32 %v90_v1, %v90_v1  ;;  %2374 = vmatprep.subr.bf16.mxu1 %v2373_v34 }
  0x38   :  { %129 = vadd.xlane.f32.xlu1 %v128_v3  ;;  %123 = vadd.xlane.f32.xlu0 %v122_v4  ;;  %v125_v8 = vsel %vm121_vm0, %v91_v5, 0.0  ;;  %v171_v9 = vmul.f32 %v91_v5, %v91_v5  ;;  %v172_v13 = vmul.f32 %v2719_v0, %v2719_v0  ;;  %v94_v14 = vld [vmem:[%s3480_s27 + $0x10] sm:$0xf]  ;;  %v173_v17 = vmul.f32 %v2727_v2, %v2727_v2  ;;  %v95_v18 = vld [vmem:[%s3480_s27 + $0x14] sm:$0xf] }
  0x39   :  { %v186_v12 = vsel %vm121_vm0, %v170_v10, 0.0  ;;  %v134_v16 = vsel %vm121_vm0, %v94_v14, 0.0  ;;  %v137_v28 = vsel %vm121_vm0, %v95_v18, 0.0  ;;  %v174_v29 = vmul.f32 %v94_v14, %v94_v14  ;;  %v96_v31 = vld [vmem:[%s3480_s27 + $0x18] sm:$0xf]  ;;  %2368 = vmatpush3.bf16.msra.mxu0 %v2365_v32 }
  0x3a   :  { %v189_v11 = vsel %vm121_vm0, %v171_v9, 0.0  ;;  %v192_v15 = vsel %vm121_vm0, %v172_v13, 0.0  ;;  %v195_v27 = vsel %vm121_vm0, %v173_v17, 0.0  ;;  %v558_v35 = vcombine.low %v90_v1, %v91_v5  ;;  %v97_v39 = vld [vmem:[%s3480_s27 + $0x1c] sm:$0xf]  ;;  %2376 = vmatpush3.bf16.msra.mxu1 %v2373_v34 }
  0x3b   :  { %v198_v36 = vsel %vm121_vm0, %v174_v29, 0.0  ;;  %v140_v37 = vsel %vm121_vm0, %v96_v31, 0.0  ;;  %v175_v38 = vmul.f32 %v95_v18, %v95_v18  ;;  %v559_v40 = vcombine.low %v2719_v0, %v2727_v2  ;;  %v98_v45 = vld [vmem:[%s3480_s27 + $0x20] sm:$0xf]  ;;  %v99_v51 = vld [vmem:[%s3480_s27 + $0x24] sm:$0xf] }
  0x3c   :  { %132 = vadd.xlane.f32.xlu1 %v131_v7  ;;  %126 = vadd.xlane.f32.xlu0 %v125_v8  ;;  %v143_v42 = vsel %vm121_vm0, %v97_v39, 0.0  ;;  %v176_v43 = vmul.f32 %v96_v31, %v96_v31  ;;  %v560_v44 = vcombine.low %v94_v14, %v95_v18  ;;  %v561_v47 = vcombine.low %v96_v31, %v97_v39  ;;  %v100_v53 = vld [vmem:[%s3480_s27 + $0x28] sm:$0xf]  ;;  %v101_v54 = vld [vmem:[%s3480_s27 + $0x2c] sm:$0xf] }
  0x3d   :  { %2272 = vmatprep.mubr.msk.f32.mxu1 %vm106_vm1, %v558_v35  ;;  %v201_v41 = vsel %vm121_vm0, %v175_v38, 0.0  ;;  %v146_v48 = vsel %vm121_vm0, %v98_v45, 0.0  ;;  %v177_v50 = vmul.f32 %v97_v39, %v97_v39  ;;  %2262 = vmatmul.mubr.msk.f32.vlgmr.msra.gmra.mrb[0].mxu0 %vm106_vm1, %v2798_v46  ;;  %v562_v52 = vcombine.low %v98_v45, %v99_v51  ;;  %v102_v58 = vld [vmem:[%s3480_s27 + $0x30] sm:$0xf]  ;;  %v103_v59 = vld [vmem:[%s3480_s27 + $0x34] sm:$0xf] }
  0x3e   :  { %v204_v49 = vsel %vm121_vm0, %v176_v43, 0.0  ;;  %2273 = vmatmul.mubr.msk.f32.vlgmr.msra.gmra.mrb[0].mxu1 %vm106_vm1, %v559_v40  ;;  %v149_v56 = vsel %vm121_vm0, %v99_v51, 0.0  ;;  %v563_v57 = vcombine.low %v100_v53, %v101_v54  ;;  %v564_v60 = vcombine.low %v102_v58, %v103_v59  ;;  %v104_v61 = vld [vmem:[%s3480_s27 + $0x38] sm:$0xf]  ;;  %v105_v62 = vld [vmem:[%s3480_s27 + $0x3c] sm:$0xf] }
  0x3f   :  { %2275 = vmatprep.mubr.msk.f32.mxu1 %vm106_vm1, %v560_v44  ;;  %v207_v55 = vsel %vm121_vm0, %v177_v50, 0.0  ;;  %v152_v63 = vsel %vm121_vm0, %v100_v53, 0.0  ;;  %v107_v0 = vsel %vm106_vm1, %v2735_v6, 0.0  ;;  %v178_v1 = vmul.f32 %v98_v45, %v98_v45 }
  0x40   :  { %190 = vadd.xlane.f32.xlu1 %v189_v11  ;;  %187 = vadd.xlane.f32.xlu0 %v186_v12  ;;  %v565_v2 = vcombine.low %v104_v61, %v105_v62  ;;  %v155_v4 = vsel %vm121_vm0, %v101_v54, 0.0  ;;  %v113_v5 = vmul.f32 %v2735_v6, %v2735_v6  ;;  %v179_v7 = vmul.f32 %v99_v51, %v99_v51 }
  0x41   :  { %v210_v3 = vsel %vm121_vm0, %v178_v1, 0.0  ;;  %v180_v10 = vmul.f32 %v100_v53, %v100_v53  ;;  %v158_v12 = vsel %vm121_vm0, %v102_v58, 0.0  ;;  %v181_v13 = vmul.f32 %v101_v54, %v101_v54 }
  0x42   :  { %2276 = vmatmul.mubr.msk.f32.gmra.mrb[2].mxu1 %vm106_vm1, %v561_v47  ;;  %v115_v8 = vsel %vm106_vm1, %v113_v5, 0.0  ;;  %v213_v9 = vsel %vm121_vm0, %v179_v7, 0.0  ;;  %v161_v14 = vsel %vm121_vm0, %v103_v59, 0.0  ;;  %v164_v17 = vsel %vm121_vm0, %v104_v61, 0.0 }
  0x43   :  { %2278 = vmatprep.mubr.msk.f32.mxu1 %vm106_vm1, %v562_v52  ;;  %v216_v11 = vsel %vm121_vm0, %v180_v10, 0.0  ;;  %v219_v6 = vsel %vm121_vm0, %v181_v13, 0.0  ;;  %v183_v18 = vmul.f32 %v103_v59, %v103_v59  ;;  %v167_v20 = vsel %vm121_vm0, %v105_v62, 0.0 }
  0x44   :  { %193 = vadd.xlane.f32.xlu1 %v192_v15  ;;  %135 = vadd.xlane.f32.xlu0 %v134_v16  ;;  %v182_v15 = vmul.f32 %v102_v58, %v102_v58  ;;  %v185_v21 = vmul.f32 %v105_v62, %v105_v62  ;;  %v184_v22 = vmul.f32 %v104_v61, %v104_v61  ;;  %v118_v26 = vsel %vm106_vm1, %v114_v25, 0.0 }
  0x45   :  { %v225_v19 = vsel %vm121_vm0, %v183_v18, 0.0  ;;  %v250_v34 = vlaneseq }
  0x46   :  { %2279 = vmatmul.mubr.msk.f32.gmra.mrb[4].mxu1 %vm106_vm1, %v563_v57  ;;  %v222_v16 = vsel %vm121_vm0, %v182_v15, 0.0  ;;  %v231_v23 = vsel %vm121_vm0, %v185_v21, 0.0  ;;  %v228_v24 = vsel %vm121_vm0, %v184_v22, 0.0 }
  0x47   :  { %2281 = vmatprep.mubr.msk.f32.mxu1 %vm106_vm1, %v564_v60  ;;  %v2864_v38 = vshrl.u32 %v250_v34, 7 }
  0x48   :  { %196 = vadd.xlane.f32.xlu1 %v195_v27  ;;  %138 = vadd.xlane.f32.xlu0 %v137_v28  ;;  %v110_v27 = vsel %vm106_vm1, %v2798_v46, 0.0 }
  0x49   :  { %v2902_v5 = vsub.s32 1, %v2864_v38  ;;  %v2918_v13 = vsub.s32 4, %v2864_v38  ;;  %v2921_v15 = vsub.s32 3, %v2864_v38 }
  0x4a   :  { %2282 = vmatmul.mubr.msk.f32.gmra.mrb[6].mxu1 %vm106_vm1, %v565_v2 }
  0x4c   :  { %199 = vadd.xlane.f32.xlu1 %v198_v36  ;;  %141 = vadd.xlane.f32.xlu0 %v140_v37  ;;  %v251_v37 = vand.u32 127, %v250_v34 }
  0x50   :  { %202 = vadd.xlane.f32.xlu1 %v201_v41  ;;  %144 = vadd.xlane.f32.xlu0 %v143_v42  ;;  %v2869_v41 = vsub.s32 %v251_v37, %v2864_v38 }
  0x54   :  { %147 = vadd.xlane.f32.xlu1 %v146_v48  ;;  %205 = vadd.xlane.f32.xlu0 %v204_v49 }
  0x58   :  { %208 = vadd.xlane.f32.xlu1 %v207_v55  ;;  %150 = vadd.xlane.f32.xlu0 %v149_v56 }
  0x5c   :  { %153 = vadd.xlane.f32.xlu1 %v152_v63  ;;  %108 = vadd.xlane.f32.xlu0 %v107_v0 }
  0x60   :  { %211 = vadd.xlane.f32.xlu1 %v210_v3  ;;  %156 = vadd.xlane.f32.xlu0 %v155_v4  ;;  %v2899_v4 = vsub.s32 0, %v2864_v38 }
  0x64   :  { %116 = vadd.xlane.f32.xlu1 %v115_v8  ;;  %214 = vadd.xlane.f32.xlu0 %v213_v9 }
  0x68   :  { %217 = vadd.xlane.f32.xlu1 %v216_v11  ;;  %159 = vadd.xlane.f32.xlu0 %v158_v12  ;;  %v2915_v12 = vsub.s32 2, %v2864_v38 }
  0x6c   :  { %220 = vadd.xlane.f32.xlu1 %v219_v6  ;;  %162 = vadd.xlane.f32.xlu0 %v161_v14 }
  0x70   :  { %223 = vadd.xlane.f32.xlu1 %v222_v16  ;;  %165 = vadd.xlane.f32.xlu0 %v164_v17  ;;  %v2924_v16 = vsub.s32 6, %v2864_v38 }
  0x74   :  { %226 = vadd.xlane.f32.xlu1 %v225_v19  ;;  %168 = vadd.xlane.f32.xlu0 %v167_v20 }
  0x78   :  { %232 = vadd.xlane.f32.xlu1 %v231_v23  ;;  %229 = vadd.xlane.f32.xlu0 %v228_v24 }
  0x7c   :  { %119 = vadd.xlane.f32.xlu1 %v118_v26  ;;  %111 = vadd.xlane.f32.xlu0 %v110_v27  ;;  %v2941_v26 = vsub.s32 5, %v2864_v38 }
  0xc5   :  { %v130_v28 = vpop.xlane.xlu1 %129  ;;  %v124_v29 = vpop.xlane.xlu0 %123 }
  0xc6   :  { %v255_v45 = vrot.slane %v124_v29, %v2869_v41  ;;  %v263_v48 = vrot.slane %v130_v28, %v2869_v41 }
  0xc9   :  { %v133_v30 = vpop.xlane.xlu1 %132  ;;  %v127_v31 = vpop.xlane.xlu0 %126 }
  0xca   :  { %v259_v44 = vrot.slane %v127_v31, %v2869_v41  ;;  %v267_v50 = vrot.slane %v133_v30, %v2869_v41 }
  0xcc   :  { %v317_v49 = vsel %vm316_vm2, %v259_v44, %v255_v45 }
  0xcd   :  { %v2858_v32 = vpop.xlane.xlu1 %190  ;;  %v2860_v33 = vpop.xlane.xlu0 %187  ;;  %v319_v53 = vsel %vm318_vm3, %v263_v48, %v317_v49 }
  0xce   :  { %v321_v57 = vsel %vm320_vm4, %v267_v50, %v319_v53  ;;  %v366_v17 = vrot.slane %v2858_v32, %v2869_v41  ;;  %v362_v18 = vrot.slane %v2860_v33, %v2869_v41 }
  0xd0   :  { %v423_v27 = vsel %vm316_vm2, %v366_v17, %v362_v18 }
  0xd1   :  { %v2862_v35 = vpop.xlane.xlu1 %193  ;;  %v136_v36 = vpop.xlane.xlu0 %135 }
  0xd2   :  { %v271_v54 = vrot.slane %v136_v36, %v2869_v41  ;;  %v370_v21 = vrot.slane %v2862_v35, %v2869_v41 }
  0xd4   :  { %v323_v61 = vsel %vm322_vm5, %v271_v54, %v321_v57  ;;  %v424_v31 = vsel %vm318_vm3, %v370_v21, %v423_v27 }
  0xd5   :  { %v2866_v39 = vpop.xlane.xlu1 %196  ;;  %v139_v40 = vpop.xlane.xlu0 %138 }
  0xd6   :  { %v275_v55 = vrot.slane %v139_v40, %v2869_v41  ;;  %v374_v22 = vrot.slane %v2866_v39, %v2869_v41 }
  0xd8   :  { %v325_v62 = vsel %vm324_vm6, %v275_v55, %v323_v61  ;;  %v425_v33 = vsel %vm320_vm4, %v374_v22, %v424_v31 }
  0xd9   :  { %v2871_v42 = vpop.xlane.xlu1 %199  ;;  %v142_v43 = vpop.xlane.xlu0 %141 }
  0xda   :  { %v279_v56 = vrot.slane %v142_v43, %v2869_v41  ;;  %v378_v23 = vrot.slane %v2871_v42, %v2869_v41  ;;  %v2960_v42 = vsub.s32 7, %v2864_v38 }
  0xdc   :  { %v327_v63 = vsel %vm326_vm7, %v279_v56, %v325_v62  ;;  %v426_v35 = vsel %vm322_vm5, %v378_v23, %v425_v33 }
  0xdd   :  { %v2875_v46 = vpop.xlane.xlu1 %202  ;;  %v145_v47 = vpop.xlane.xlu0 %144 }
  0xde   :  { %v283_v58 = vrot.slane %v145_v47, %v2869_v41  ;;  %v382_v28 = vrot.slane %v2875_v46, %v2869_v41 }
  0xe0   :  { %v329_v1 = vsel %vm328_vm8, %v283_v58, %v327_v63  ;;  %v427_v39 = vsel %vm324_vm6, %v382_v28, %v426_v35 }
  0xe1   :  { %v2880_v51 = vpop.xlane.xlu1 %147  ;;  %v2882_v52 = vpop.xlane.xlu0 %205 }
  0xe2   :  { %v386_v32 = vrot.slane %v2882_v52, %v2869_v41  ;;  %v287_v48 = vrot.slane %v2880_v51, %v2869_v41 }
  0xe4   :  { %v428_v43 = vsel %vm326_vm7, %v386_v32, %v427_v39 }
  0xe5   :  { %v209_v59 = vpop.xlane.xlu1 %208  ;;  %v2890_v60 = vpop.xlane.xlu0 %150 }
  0xe6   :  { %v390_v34 = vrot.slane %v209_v59, %v2869_v41  ;;  %v291_v49 = vrot.slane %v2890_v60, %v2869_v41 }
  0xe8   :  { %v429_v44 = vsel %vm328_vm8, %v390_v34, %v428_v43  ;;  %v330_v60 = vsel %vm316_vm2, %v291_v49, %v287_v48 }
  0xe9   :  { %v2895_v0 = vpop.xlane.xlu1 %153  ;;  %v109_v2 = vpop.xlane.xlu0 %108 }
  0xea   :  { %v339_v3 = vadd.f32 %v329_v1, %v109_v2  ;;  %v295_v54 = vrot.slane %v2895_v0, %v2869_v41 }
  0xec   :  { %v2904_v7 = vmul.f32 0.015625, %v339_v3  ;;  %v331_v3 = vsel %vm318_vm3, %v295_v54, %v330_v60 }
  0xed   :  { %v2906_v8 = vpop.xlane.xlu1 %211  ;;  %v2908_v9 = vpop.xlane.xlu0 %156 }
  0xee   :  { %v1031_v10 = vrot.slane %v2904_v7, %v2902_v5  ;;  %v1024_v11 = vrot.slane %v2904_v7, %v2899_v4  ;;  %v1038_v19 = vrot.slane %v2904_v7, %v2915_v12  ;;  %v1052_v20 = vrot.slane %v2904_v7, %v2918_v13 }
  0xef   :  { %v1045_v29 = vrot.slane %v2904_v7, %v2921_v15  ;;  %v1066_v30 = vrot.slane %v2904_v7, %v2924_v16  ;;  %v1059_v40 = vrot.slane %v2904_v7, %v2941_v26  ;;  %v1073_v50 = vrot.slane %v2904_v7, %v2960_v42 }
  0xf0   :  { %1033 = vbcast.lane.b32.xlu1 %v1031_v10, 256  ;;  %1026 = vbcast.lane.b32.xlu0 %v1024_v11, 256  ;;  %v394_v52 = vrot.slane %v2906_v8, %v2869_v41  ;;  %v299_v51 = vrot.slane %v2908_v9, %v2869_v41  ;;  %v443_v63 = vmul.f32 %v2904_v7, %v2904_v7 }
  0xf1   :  { %v117_v6 = vpop.xlane.xlu1 %116  ;;  %v215_v14 = vpop.xlane.xlu0 %214 }
  0xf2   :  { %v439_v45 = vadd.f32 %v429_v44, %v117_v6  ;;  %v398_v53 = vrot.slane %v215_v14, %v2869_v41  ;;  %v332_v10 = vsel %vm320_vm4, %v299_v51, %v331_v3 }
  0xf4   :  { %1040 = vbcast.lane.b32.xlu1 %v1038_v19, 256  ;;  %1054 = vbcast.lane.b32.xlu0 %v1052_v20, 256  ;;  %v441_v56 = vmul.f32 0.015625, %v439_v45  ;;  %v430_v0 = vsel %vm316_vm2, %v398_v53, %v394_v52  ;;  %v2588_v52 = vmov 1966171168  }
  0xf5   :  { %v218_v24 = vpop.xlane.xlu1 %217  ;;  %v160_v25 = vpop.xlane.xlu0 %159  ;;  %v829_v53 = vunpack.c.l.s4 %v2588_v52 }
  0xf6   :  { %v402_v55 = vrot.slane %v218_v24, %v2869_v41  ;;  %v303_v61 = vrot.slane %v160_v25, %v2869_v41  ;;  %v445_v11 = vsub.f32 %v441_v56, %v443_v63 }
  0xf7   :  { %v830_v56 = vunpack.c.0.s8 %v829_v53 }
  0xf8   :  { %1047 = vbcast.lane.b32.xlu1 %v1045_v29, 256  ;;  %1068 = vbcast.lane.b32.xlu0 %v1066_v30, 256  ;;  %v431_v8 = vsel %vm318_vm3, %v402_v55, %v430_v0  ;;  %v333_v18 = vsel %vm322_vm5, %v303_v61, %v332_v10  ;;  %v447_v27 = vmax.f32 %v445_v11, 0.0 }
  0xf9   :  { %v221_v36 = vpop.xlane.xlu1 %220  ;;  %v163_v37 = vpop.xlane.xlu0 %162  ;;  %v833_v60 = vsub.s32 %v830_v56, %v2864_v38 }
  0xfa   :  { %v406_v57 = vrot.slane %v221_v36, %v2869_v41  ;;  %v307_v1 = vrot.slane %v163_v37, %v2869_v41  ;;  %v449_v35 = vadd.f32 1e-05, %v447_v27 }
  0xfc   :  { %1061 = vbcast.lane.b32.xlu1 %v1059_v40, 256  ;;  %v432_v6 = vsel %vm320_vm4, %v406_v57, %v431_v8  ;;  %v334_v22 = vsel %vm324_vm6, %v307_v1, %v333_v18  ;;  %2450 = vrsqrt.f32 %v449_v35 }
  0xfd   :  { %v224_v46 = vpop.xlane.xlu1 %223  ;;  %v166_v47 = vpop.xlane.xlu0 %165 }
  0xfe   :  { %v410_v62 = vrot.slane %v224_v46, %v2869_v41  ;;  %v311_v9 = vrot.slane %v166_v47, %v2869_v41 }
 0x100   :  { %1075 = vbcast.lane.b32.xlu1 %v1073_v50, 256  ;;  %v433_v19 = vsel %vm322_vm5, %v410_v62, %v432_v6  ;;  %v335_v25 = vsel %vm326_vm7, %v311_v9, %v334_v22 }
 0x101   :  { %v227_v58 = vpop.xlane.xlu1 %226  ;;  %v169_v59 = vpop.xlane.xlu0 %168 }
 0x102   :  { %v414_v2 = vrot.slane %v227_v58, %v2869_v41  ;;  %v315_v14 = vrot.slane %v169_v59, %v2869_v41 }
 0x104   :  { %v434_v23 = vsel %vm324_vm6, %v414_v2, %v433_v19  ;;  %v336_v30 = vsel %vm328_vm8, %v315_v14, %v335_v25 }
 0x105   :  { %v233_v7 = vpop.xlane.xlu1 %232  ;;  %v230_v17 = vpop.xlane.xlu0 %229 }
 0x106   :  { %v422_v20 = vrot.slane %v233_v7, %v2869_v41  ;;  %v418_v21 = vrot.slane %v230_v17, %v2869_v41  ;;  %v2451_v54 = vpop.eup %2450 }
 0x107   :  { %v723_v55 = vrot.slane %v2451_v54, %v2902_v5  ;;  %v716_v51 = vrot.slane %v2451_v54, %v2899_v4  ;;  %v737_v58 = vrot.slane %v2451_v54, %v2921_v15  ;;  %v730_v59 = vrot.slane %v2451_v54, %v2915_v12 }
 0x108   :  { %v435_v24 = vsel %vm326_vm7, %v418_v21, %v434_v23  ;;  %v751_v61 = vrot.slane %v2451_v54, %v2941_v26  ;;  %v744_v62 = vrot.slane %v2451_v54, %v2918_v13  ;;  %v765_v63 = vrot.slane %v2451_v54, %v2960_v42  ;;  %v1290_v21 = vld [vmem:[%s3460_s8 + $0x8] sm:$0xff] }
 0x109   :  { %v120_v28 = vpop.xlane.xlu1 %119  ;;  %v436_v29 = vsel %vm328_vm8, %v422_v20, %v435_v24  ;;  %v112_v31 = vpop.xlane.xlu0 %111  ;;  %v758_v0 = vrot.slane %v2451_v54, %v2924_v16  ;;  %v1289_v20 = vld [vmem:[%s3460_s8] sm:$0xff] }
 0x10a   :  { %v440_v32 = vadd.f32 %v436_v29, %v120_v28  ;;  %v340_v33 = vadd.f32 %v336_v30, %v112_v31  ;;  %v2377_v25 = vpack.c.bf16 %v1290_v21, %v1289_v20 }
 0x10c   :  { %v342_v34 = vmul.f32 0.015625, %v340_v33  ;;  %v442_v41 = vmul.f32 0.015625, %v440_v32  ;;  %2378 = vmatprep.subr.bf16.mxu0 %v2377_v25 }
 0x10d   :  { %2380 = vmatpush3.bf16.msra.mxu0 %v2377_v25  ;;  %v1291_v25 = vld [vmem:[%s3460_s8 + $0x10] sm:$0xff] }
 0x10e   :  { %v444_v36 = vmul.f32 %v342_v34, %v342_v34  ;;  %v1087_v37 = vrot.slane %v342_v34, %v2902_v5  ;;  %v1080_v39 = vrot.slane %v342_v34, %v2899_v4  ;;  %v1101_v44 = vrot.slane %v342_v34, %v2921_v15 }
 0x10f   :  { %v1094_v45 = vrot.slane %v342_v34, %v2915_v12  ;;  %v1115_v47 = vrot.slane %v342_v34, %v2941_v26  ;;  %v1108_v48 = vrot.slane %v342_v34, %v2918_v13  ;;  %v1129_v49 = vrot.slane %v342_v34, %v2960_v42 }
 0x110   :  { %v446_v40 = vsub.f32 %v442_v41, %v444_v36  ;;  %1089 = vbcast.lane.b32.xlu1 %v1087_v37, 256  ;;  %1082 = vbcast.lane.b32.xlu0 %v1080_v39, 256  ;;  %v1122_v50 = vrot.slane %v342_v34, %v2924_v16  ;;  %v2263_v3 = vpop.f32.mrb[0].mxu0 }
 0x111   :  { %v2274_v8 = vpop.f32.mrb[0].mxu1  ;;  %v876_v10 = vcombine.high %v2263_v3, %v2263_v3  ;;  %v883_v11 = vrot.slane %v2263_v3, %v833_v60  ;;  %v529_v6 = vpop.f32.mrb[1].mxu0 }
 0x112   :  { %v448_v43 = vmax.f32 %v446_v40, 0.0  ;;  %v648_v14 = vpop.f32.mrb[1].mxu1  ;;  %v827_v7 = vcombine.high %v529_v6, %v529_v6  ;;  %v834_v17 = vrot.slane %v529_v6, %v833_v60  ;;  %v696_v18 = vcombine.high %v2274_v8, %v2274_v8 }
 0x113   :  { %v695_v19 = vcombine.high %v648_v14, %v648_v14  ;;  %v890_v22 = vrot.slane %v876_v10, %v833_v60  ;;  %v891_v23 = vcombine.high %v883_v11, %v883_v11  ;;  %v3036_v24 = vrot.slane %v883_v11, %v833_v60 }
 0x114   :  { %v450_v46 = vadd.f32 1e-05, %v448_v43  ;;  %1103 = vbcast.lane.b32.xlu1 %v1101_v44, 256  ;;  %1096 = vbcast.lane.b32.xlu0 %v1094_v45, 256  ;;  %v841_v27 = vrot.slane %v827_v7, %v833_v60  ;;  %v842_v28 = vcombine.high %v834_v17, %v834_v17  ;;  %v850_v29 = vrot.slane %v834_v17, %v833_v60 }
 0x115   :  { %v2277_v30 = vpop.f32.mrb[2].mxu1  ;;  %v892_v31 = vcombine.high %v890_v22, %v890_v22  ;;  %v3038_v32 = vrot.slane %v890_v22, %v833_v60  ;;  %v913_v33 = vrot.slane %v891_v23, %v833_v60  ;;  %v921_v45 = vcombine.high %v3036_v24, %v3036_v24 }
 0x116   :  { %2452 = vrsqrt.f32 %v450_v46  ;;  %v698_v34 = vcombine.high %v2277_v30, %v2277_v30  ;;  %v658_v35 = vpop.f32.mrb[3].mxu1  ;;  %v843_v41 = vcombine.high %v841_v27, %v841_v27  ;;  %v857_v36 = vrot.slane %v841_v27, %v833_v60 }
 0x117   :  { %v864_v37 = vrot.slane %v842_v28, %v833_v60  ;;  %v872_v39 = vcombine.high %v850_v29, %v850_v29  ;;  %v3040_v40 = vrot.slane %v892_v31, %v833_v60  ;;  %v928_v43 = vrot.slane %v850_v29, %v2899_v4 }
 0x118   :  { %1117 = vbcast.lane.b32.xlu1 %v1115_v47, 256  ;;  %1110 = vbcast.lane.b32.xlu0 %v1108_v48, 256  ;;  %v697_v44 = vcombine.high %v658_v35, %v658_v35  ;;  %v871_v46 = vrot.slane %v843_v41, %v833_v60  ;;  %v873_v53 = vcombine.high %v857_v36, %v857_v36 }
 0x119   :  { %v874_v47 = vcombine.high %v864_v37, %v864_v37  ;;  %v936_v48 = vrot.slane %v872_v39, %v2899_v4  ;;  %v3047_v52 = vadd.f32 %v928_v43, %v648_v14  ;;  %v944_v54 = vrot.slane %v857_v36, %v2899_v4 }
 0x11a   :  { %v923_v6 = vcombine.high %v913_v33, %v913_v33  ;;  %v968_v14 = vrot.slane %v921_v45, %v2899_v4  ;;  %v922_v22 = vcombine.high %v3038_v32, %v3038_v32  ;;  %v924_v23 = vcombine.high %v3040_v40, %v3040_v40  ;;  %v3127_v45 = vld [vmem:[%s3481_s22 + $0x8] sm:$0xff] }
 0x11b   :  { %v3051_v56 = vadd.f32 %v2274_v8, %v936_v48 }
 0x11c   :  { %1131 = vbcast.lane.b32.xlu1 %v1129_v49, 256  ;;  %1124 = vbcast.lane.b32.xlu0 %v1122_v50, 256  ;;  %v2280_v49 = vpop.f32.mrb[4].mxu1  ;;  %v932_v50 = vrot.slane %v864_v37, %v2899_v4  ;;  %v972_v20 = vrot.slane %v923_v6, %v2899_v4  ;;  %v984_v31 = vrot.slane %v922_v22, %v2899_v4 }
 0x11d   :  { %v3073_v21 = vadd.f32 %v2280_v49, %v968_v14 }
 0x11e   :  { %v3054_v60 = vadd.f32 %v932_v50, %v695_v19  ;;  %v1577_v50 = vrot.slane %v3127_v45, %v2902_v5 }
 0x120   :  { %725 = vbcast.lane.b32.xlu1 %v723_v55, 256  ;;  %718 = vbcast.lane.b32.xlu0 %v716_v51, 256  ;;  %v3013_v57 = vpop.eup %2452  ;;  %v668_v55 = vpop.f32.mrb[5].mxu1  ;;  %v940_v51 = vrot.slane %v874_v47, %v2899_v4 }
 0x121   :  { %v779_v1 = vrot.slane %v3013_v57, %v2902_v5  ;;  %v772_v2 = vrot.slane %v3013_v57, %v2899_v4  ;;  %v793_v38 = vrot.slane %v3013_v57, %v2921_v15  ;;  %v786_v9 = vrot.slane %v3013_v57, %v2915_v12  ;;  %v2283_v8 = vpop.f32.mrb[6].mxu1 }
 0x122   :  { %v699_v7 = vcombine.high %v668_v55, %v668_v55  ;;  %v678_v17 = vpop.f32.mrb[7].mxu1  ;;  %v3107_v36 = vadd.f32 %v2283_v8, %v984_v31 }
 0x123   :  { %v701_v29 = vcombine.high %v678_v17, %v678_v17 }
 0x124   :  { %739 = vbcast.lane.b32.xlu1 %v737_v58, 256  ;;  %732 = vbcast.lane.b32.xlu0 %v730_v59, 256  ;;  %v875_v58 = vcombine.high %v871_v46, %v871_v46  ;;  %v948_v59 = vrot.slane %v871_v46, %v2899_v4 }
 0x126   :  { %v956_v3 = vrot.slane %v875_v58, %v2899_v4  ;;  %v3062_v10 = vadd.f32 %v948_v59, %v697_v44  ;;  %v814_v44 = vrot.slane %v3013_v57, %v2924_v16  ;;  %v1605_v58 = vrot.slane %v3127_v45, %v2941_v26 }
 0x127   :  { %v1619_v59 = vrot.slane %v3127_v45, %v2960_v42 }
 0x128   :  { %753 = vbcast.lane.b32.xlu1 %v751_v61, 256  ;;  %746 = vbcast.lane.b32.xlu0 %v744_v62, 256  ;;  %v952_v61 = vrot.slane %v873_v53, %v2899_v4  ;;  %v3057_v62 = vadd.f32 %v944_v54, %v658_v35  ;;  %v3067_v19 = vadd.f32 %v956_v3, %v698_v34 }
 0x129   :  { %v976_v34 = vrot.slane %v3038_v32, %v2899_v4  ;;  %v980_v35 = vrot.slane %v3040_v40, %v2899_v4  ;;  %v821_v32 = vrot.slane %v3013_v57, %v2960_v42  ;;  %v3122_v40 = vld [vmem:[%s3481_s22] sm:$0xff] }
 0x12a   :  { %v3064_v11 = vadd.f32 %v2277_v30, %v952_v61  ;;  %v1521_v46 = vrot.slane %v3122_v40, %v2902_v5  ;;  %v1514_v47 = vrot.slane %v3122_v40, %v2899_v4  ;;  %v1528_v48 = vrot.slane %v3122_v40, %v2915_v12 }
 0x12b   :  { %v3111_v39 = vadd.f32 %v976_v34, %v678_v17  ;;  %v3113_v43 = vadd.f32 %v980_v35, %v701_v29  ;;  %v1542_v53 = vrot.slane %v3122_v40, %v2918_v13  ;;  %v1549_v54 = vrot.slane %v3122_v40, %v2941_v26  ;;  %v3179_v34 = vld [vmem:[%s3459_s7] ss:$0 sm:$0xff] }
 0x12c   :  { %767 = vbcast.lane.b32.xlu1 %v765_v63, 256  ;;  %760 = vbcast.lane.b32.xlu0 %v758_v0, 256  ;;  %v700_v63 = vcombine.high %v2280_v49, %v2280_v49  ;;  %v3059_v0 = vadd.f32 %v940_v51, %v696_v18  ;;  %v702_v18 = vcombine.high %v2283_v8, %v2283_v8 }
 0x12d   :  { %v1535_v49 = vrot.slane %v3122_v40, %v2921_v15  ;;  %v1556_v5 = vrot.slane %v3122_v40, %v2924_v16  ;;  %v1598_v51 = vrot.slane %v3127_v45, %v2918_v13 }
 0x12e   :  { %v3095_v30 = vadd.f32 %v972_v20, %v700_v63 }
 0x130   :  { %781 = vbcast.lane.b32.xlu1 %v779_v1, 256  ;;  %774 = vbcast.lane.b32.xlu0 %v772_v2, 256  ;;  %v960_v1 = vrot.slane %v3036_v24, %v2899_v4  ;;  %v964_v2 = vrot.slane %v913_v33, %v2899_v4  ;;  %v1292_v24 = vld [vmem:[%s3460_s8 + $0x18] sm:$0xff]  ;;  %v988_v33 = vrot.slane %v924_v23, %v2899_v4 }
 0x131   :  { %v2381_v41 = vpack.c.bf16 %v1292_v24, %v1291_v25 }
 0x132   :  { %v3091_v27 = vadd.f32 %v960_v1, %v668_v55  ;;  %v3093_v28 = vadd.f32 %v964_v2, %v699_v7  ;;  %v3109_v37 = vadd.f32 %v988_v33, %v702_v18  ;;  %v1591_v55 = vrot.slane %v3127_v45, %v2921_v15 }
 0x133   :  { %2382 = vmatprep.subr.bf16.mxu0 %v2381_v41  ;;  %v1612_v15 = vrot.slane %v3127_v45, %v2924_v16  ;;  %v3164_v16 = vld [vmem:[%s3458_s6] ss:$0 sm:$0xff] }
 0x134   :  { %795 = vbcast.lane.b32.xlu1 %v793_v38, 256  ;;  %788 = vbcast.lane.b32.xlu0 %v786_v9, 256  ;;  %v807_v38 = vrot.slane %v3013_v57, %v2941_v26  ;;  %v800_v9 = vrot.slane %v3013_v57, %v2918_v13  ;;  %v1570_v57 = vrot.slane %v3127_v45, %v2899_v4 }
 0x135   :  { %2384 = vmatpush3.bf16.msra.mxu0 %v2381_v41  ;;  %v1584_v4 = vrot.slane %v3127_v45, %v2915_v12  ;;  %v1563_v12 = vrot.slane %v3122_v40, %v2960_v42 }
 0x138   :  { %809 = vbcast.lane.b32.xlu1 %v807_v38, 256  ;;  %802 = vbcast.lane.b32.xlu0 %v800_v9, 256 }
 0x13c   :  { %823 = vbcast.lane.b32.xlu1 %v821_v32, 256  ;;  %816 = vbcast.lane.b32.xlu0 %v814_v44, 256 }
 0x140   :  { %1523 = vbcast.lane.b32.xlu1 %v1521_v46, 256  ;;  %1516 = vbcast.lane.b32.xlu0 %v1514_v47, 256 }
 0x144   :  { %1572 = vbcast.lane.b32.xlu1 %v1570_v57, 256  ;;  %1530 = vbcast.lane.b32.xlu0 %v1528_v48, 256 }
 0x148   :  { %1537 = vbcast.lane.b32.xlu1 %v1535_v49, 256  ;;  %1579 = vbcast.lane.b32.xlu0 %v1577_v50, 256 }
 0x14c   :  { %1544 = vbcast.lane.b32.xlu1 %v1542_v53, 256  ;;  %1586 = vbcast.lane.b32.xlu0 %v1584_v4, 256 }
 0x150   :  { %1551 = vbcast.lane.b32.xlu1 %v1549_v54, 256  ;;  %1593 = vbcast.lane.b32.xlu0 %v1591_v55, 256 }
 0x154   :  { %1558 = vbcast.lane.b32.xlu1 %v1556_v5, 256  ;;  %1600 = vbcast.lane.b32.xlu0 %v1598_v51, 256 }
 0x158   :  { %1565 = vbcast.lane.b32.xlu1 %v1563_v12, 256  ;;  %1607 = vbcast.lane.b32.xlu0 %v1605_v58, 256 }
 0x15c   :  { %1614 = vbcast.lane.b32.xlu0 %v1612_v15, 256  ;;  %1621 = vbcast.lane.b32.xlu1 %v1619_v59, 256 }
 0x162   :  { %v1034_v61 = vpop.permute.xlu1 %1033  ;;  %v1027_v63 = vpop.permute.xlu0 %1026 }
 0x163   :  { %v1140_v20 = vmul.f32 %v3164_v16, %v1034_v61  ;;  %v1139_v22 = vmul.f32 %v3164_v16, %v1027_v63 }
 0x165   :  { %v1156_v24 = vsub.f32 %v3054_v60, %v1140_v20  ;;  %v1155_v29 = vsub.f32 %v3047_v52, %v1139_v22 }
 0x166   :  { %v1041_v13 = vpop.permute.xlu1 %1040  ;;  %v1055_v8 = vpop.permute.xlu0 %1054 }
 0x167   :  { %v1141_v31 = vmul.f32 %v3164_v16, %v1041_v13  ;;  %v1143_v32 = vmul.f32 %v3164_v16, %v1055_v8 }
 0x169   :  { %v1157_v57 = vsub.f32 %v3051_v56, %v1141_v31  ;;  %v1159_v5 = vsub.f32 %v3057_v62, %v1143_v32 }
 0x16a   :  { %v1048_v3 = vpop.permute.xlu1 %1047  ;;  %v1069_v14 = vpop.permute.xlu0 %1068 }
 0x16b   :  { %v1142_v33 = vmul.f32 %v3164_v16, %v1048_v3  ;;  %v1145_v54 = vmul.f32 %v3164_v16, %v1069_v14 }
 0x16d   :  { %v1158_v46 = vsub.f32 %v3059_v0, %v1142_v33 }
 0x16e   :  { %v1062_v6 = vpop.permute.xlu1 %1061 }
 0x16f   :  { %v1144_v44 = vmul.f32 %v3164_v16, %v1062_v6 }
 0x171   :  { %v1160_v55 = vsub.f32 %v3062_v10, %v1144_v44 }
 0x172   :  { %v1076_v7 = vpop.permute.xlu1 %1075 }
 0x173   :  { %v1146_v51 = vmul.f32 %v3164_v16, %v1076_v7 }
 0x175   :  { %v1162_v14 = vsub.f32 %v3067_v19, %v1146_v51 }
 0x182   :  { %v1090_v17 = vpop.permute.xlu1 %1089  ;;  %v1083_v26 = vpop.permute.xlu0 %1082 }
 0x183   :  { %v1148_v61 = vmul.f32 %v3164_v16, %v1090_v17  ;;  %v1147_v13 = vmul.f32 %v3164_v16, %v1083_v26  ;;  %v1161_v17 = vsub.f32 %v3064_v11, %v1145_v54 }
 0x185   :  { %v1163_v31 = vsub.f32 %v3091_v27, %v1147_v13 }
 0x186   :  { %v1104_v1 = vpop.permute.xlu1 %1103  ;;  %v1097_v2 = vpop.permute.xlu0 %1096 }
 0x187   :  { %v1150_v62 = vmul.f32 %v3164_v16, %v1104_v1  ;;  %v1149_v3 = vmul.f32 %v3164_v16, %v1097_v2 }
 0x189   :  { %v1166_v19 = vsub.f32 %v3095_v30, %v1150_v62  ;;  %v1165_v33 = vsub.f32 %v3073_v21, %v1149_v3 }
 0x18a   :  { %v1118_v42 = vpop.permute.xlu1 %1117  ;;  %v1111_v18 = vpop.permute.xlu0 %1110 }
 0x18b   :  { %v1152_v20 = vmul.f32 %v3164_v16, %v1118_v42  ;;  %v1151_v11 = vmul.f32 %v3164_v16, %v1111_v18 }
 0x18d   :  { %v1168_v21 = vsub.f32 %v3113_v43, %v1152_v20 }
 0x18e   :  { %v3168_v23 = vpop.permute.xlu1 %1131  ;;  %v3170_v25 = vpop.permute.xlu0 %1124 }
 0x192   :  { %v726_v38 = vpop.permute.xlu1 %725  ;;  %v719_v9 = vpop.permute.xlu0 %718 }
 0x193   :  { %v1172_v35 = vmul.f32 %v1156_v24, %v726_v38  ;;  %v1171_v41 = vmul.f32 %v1155_v29, %v719_v9  ;;  %v1164_v29 = vsub.f32 %v3093_v28, %v1148_v61  ;;  %v3224_v28 = vmul.f32 %v3164_v16, %v3168_v23 }
 0x194   :  { %v1153_v23 = vmul.f32 %v3164_v16, %v3170_v25 }
 0x195   :  { %v1194_v60 = vadd.f32 %v3179_v34, %v1172_v35  ;;  %v1193_v52 = vadd.f32 %v3179_v34, %v1171_v41 }
 0x196   :  { %v740_v47 = vpop.permute.xlu1 %739  ;;  %v733_v48 = vpop.permute.xlu0 %732 }
 0x197   :  { %v1226_v49 = vmul.f32 0.70710677, %v1194_v60  ;;  %v1225_v50 = vmul.f32 0.70710677, %v1193_v52  ;;  %v1174_v53 = vmul.f32 %v1158_v46, %v740_v47  ;;  %v1173_v4 = vmul.f32 %v1157_v57, %v733_v48 }
 0x198   :  { %v1210_v18 = vmul.f32 0.5, %v1194_v60  ;;  %v1209_v46 = vmul.f32 0.5, %v1193_v52  ;;  %v1167_v52 = vsub.f32 %v3111_v39, %v1151_v11 }
 0x199   :  { %2454 = verf.f32 %v1226_v49  ;;  %v1196_v0 = vadd.f32 %v3179_v34, %v1174_v53  ;;  %v3193_v12 = vadd.f32 %v3179_v34, %v1173_v4 }
 0x19a   :  { %2456 = verf.f32 %v1225_v50  ;;  %v754_v56 = vpop.permute.xlu1 %753  ;;  %v747_v58 = vpop.permute.xlu0 %746 }
 0x19b   :  { %v1176_v15 = vmul.f32 %v1160_v55, %v754_v56  ;;  %v1175_v59 = vmul.f32 %v1159_v5, %v747_v58  ;;  %v1228_v63 = vmul.f32 0.70710677, %v1196_v0  ;;  %v1227_v10 = vmul.f32 0.70710677, %v3193_v12 }
 0x19c   :  { %v1170_v55 = vsub.f32 %v3109_v37, %v3224_v28  ;;  %v1212_v51 = vmul.f32 0.5, %v1196_v0 }
 0x19d   :  { %v3201_v8 = vadd.f32 %v3179_v34, %v1176_v15  ;;  %v3204_v6 = vadd.f32 %v3179_v34, %v1175_v59  ;;  %2458 = verf.f32 %v1228_v63  ;;  %v1211_v59 = vmul.f32 0.5, %v3193_v12 }
 0x19e   :  { %v768_v7 = vpop.permute.xlu1 %767  ;;  %v761_v26 = vpop.permute.xlu0 %760  ;;  %2460 = verf.f32 %v1227_v10 }
 0x19f   :  { %v1230_v1 = vmul.f32 0.70710677, %v3201_v8  ;;  %v1229_v2 = vmul.f32 0.70710677, %v3204_v6  ;;  %v1178_v22 = vmul.f32 %v1162_v14, %v768_v7  ;;  %v1177_v24 = vmul.f32 %v1161_v17, %v761_v26 }
 0x1a0   :  { %v1169_v7 = vsub.f32 %v3107_v36, %v1153_v23  ;;  %v1214_v26 = vmul.f32 0.5, %v3201_v8 }
 0x1a1   :  { %2462 = verf.f32 %v1230_v1  ;;  %v3217_v42 = vadd.f32 %v3179_v34, %v1178_v22  ;;  %v3220_v38 = vadd.f32 %v3179_v34, %v1177_v24 }
 0x1a2   :  { %2464 = verf.f32 %v1229_v2  ;;  %v782_v9 = vpop.permute.xlu1 %781  ;;  %v775_v35 = vpop.permute.xlu0 %774  ;;  %v1213_v2 = vmul.f32 0.5, %v3204_v6 }
 0x1a3   :  { %v2455_v41 = vpop.eup %2454  ;;  %v1180_v27 = vmul.f32 %v1164_v29, %v782_v9  ;;  %v1179_v30 = vmul.f32 %v1163_v31, %v775_v35  ;;  %v1232_v47 = vmul.f32 0.70710677, %v3217_v42  ;;  %v1231_v48 = vmul.f32 0.70710677, %v3220_v38 }
 0x1a4   :  { %v2457_v32 = vpop.eup %2456  ;;  %v1258_v44 = vadd.f32 1.0, %v2455_v41  ;;  %v1216_v41 = vmul.f32 0.5, %v3217_v42 }
 0x1a5   :  { %v1257_v57 = vadd.f32 1.0, %v2457_v32  ;;  %v3230_v49 = vadd.f32 %v3179_v34, %v1180_v27  ;;  %v3233_v50 = vadd.f32 %v3179_v34, %v1179_v30  ;;  %2466 = verf.f32 %v1232_v47 }
 0x1a6   :  { %v1274_v53 = vmul.f32 %v1258_v44, %v1210_v18  ;;  %v796_v43 = vpop.permute.xlu1 %795  ;;  %v789_v60 = vpop.permute.xlu0 %788  ;;  %2468 = verf.f32 %v1231_v48  ;;  %v1215_v32 = vmul.f32 0.5, %v3220_v38 }
 0x1a7   :  { %v1273_v4 = vmul.f32 %v1257_v57, %v1209_v46  ;;  %v1234_v54 = vmul.f32 0.70710677, %v3230_v49  ;;  %v2459_v5 = vpop.eup %2458  ;;  %v1233_v56 = vmul.f32 0.70710677, %v3233_v50  ;;  %v1182_v58 = vmul.f32 %v1166_v19, %v796_v43 }
 0x1a8   :  { %v1181_v15 = vmul.f32 %v1165_v33, %v789_v60  ;;  %v2461_v16 = vpop.eup %2460  ;;  %v1260_v25 = vadd.f32 1.0, %v2459_v5  ;;  %v1217_v38 = vmul.f32 0.5, %v3233_v50 }
 0x1a9   :  { %2470 = verf.f32 %v1234_v54  ;;  %v1316_v61 = vcombine.low %v1273_v4, %v1274_v53  ;;  %v1259_v39 = vadd.f32 1.0, %v2461_v16  ;;  %v1204_v13 = vadd.f32 %v3179_v34, %v1182_v58 }
 0x1aa   :  { %2472 = verf.f32 %v1233_v56  ;;  %v3245_v63 = vadd.f32 %v3179_v34, %v1181_v15  ;;  %v810_v37 = vpop.permute.xlu1 %809  ;;  %v803_v10 = vpop.permute.xlu0 %802  ;;  %v1276_v62 = vmul.f32 %v1260_v25, %v1212_v51  ;;  %v1218_v53 = vmul.f32 0.5, %v3230_v49 }
 0x1ab   :  { %v2463_v0 = vpop.eup %2462  ;;  %v1184_v3 = vmul.f32 %v1168_v21, %v810_v37  ;;  %2292 = vmatprep.mubr.msk.f32.mxu0 %vm106_vm1, %v1316_v61  ;;  %v1183_v14 = vmul.f32 %v1167_v52, %v803_v10  ;;  %v1275_v17 = vmul.f32 %v1259_v39, %v1211_v59  ;;  %v1236_v1 = vmul.f32 0.70710677, %v1204_v13 }
 0x1ac   :  { %v2465_v12 = vpop.eup %2464  ;;  %v1262_v20 = vadd.f32 1.0, %v2463_v0  ;;  %v1235_v24 = vmul.f32 0.70710677, %v3245_v63  ;;  %v1220_v56 = vmul.f32 0.5, %v1204_v13  ;;  %v1219_v49 = vmul.f32 0.5, %v3245_v63 }
 0x1ad   :  { %v1261_v22 = vadd.f32 1.0, %v2465_v12  ;;  %v1206_v29 = vadd.f32 %v3179_v34, %v1184_v3  ;;  %v1317_v31 = vcombine.low %v1275_v17, %v1276_v62  ;;  %2474 = verf.f32 %v1236_v1 }
 0x1ae   :  { %v1278_v19 = vmul.f32 %v1262_v20, %v1214_v26  ;;  %v1205_v33 = vadd.f32 %v3179_v34, %v1183_v14  ;;  %v824_v11 = vpop.permute.xlu1 %823  ;;  %v817_v36 = vpop.permute.xlu0 %816  ;;  %2476 = verf.f32 %v1235_v24  ;;  %v1758_v24 = vld [vmem:[%s3462_s10] sm:$0xff] }
 0x1af   :  { %v1277_v9 = vmul.f32 %v1261_v22, %v1213_v2  ;;  %v1238_v35 = vmul.f32 0.70710677, %v1206_v29  ;;  %v2467_v8 = vpop.eup %2466  ;;  %v1186_v6 = vmul.f32 %v1170_v55, %v824_v11  ;;  %2293 = vmatmul.mubr.msk.f32.vlgmr.msra.gmra.mrb[2].mxu0 %vm106_vm1, %v1317_v31  ;;  %v1185_v27 = vmul.f32 %v1169_v7, %v817_v36 }
 0x1b0   :  { %v1237_v28 = vmul.f32 0.70710677, %v1205_v33  ;;  %v2469_v30 = vpop.eup %2468  ;;  %v1264_v21 = vadd.f32 1.0, %v2467_v8  ;;  %v1222_v39 = vmul.f32 0.5, %v1206_v29  ;;  %v1221_v10 = vmul.f32 0.5, %v1205_v33  ;;  %v1759_v29 = vld [vmem:[%s3462_s10 + $0x8] sm:$0xff] }
 0x1b1   :  { %2478 = verf.f32 %v1238_v35  ;;  %v1318_v18 = vcombine.low %v1277_v9, %v1278_v19  ;;  %v1263_v44 = vadd.f32 1.0, %v2469_v30  ;;  %v1208_v46 = vadd.f32 %v3179_v34, %v1186_v6  ;;  %v1760_v19 = vld [vmem:[%s3462_s10 + $0x10] sm:$0xff]  ;;  %v1761_v33 = vld [vmem:[%s3462_s10 + $0x18] sm:$0xff]  ;;  %v3285_v35 = vld [vmem:[%s3461_s9] ss:$0 sm:$0xff] }
 0x1b2   :  { %2480 = verf.f32 %v1237_v28  ;;  %v1207_v47 = vadd.f32 %v3179_v34, %v1185_v27  ;;  %v1280_v48 = vmul.f32 %v1264_v21, %v1216_v41  ;;  %v2385_v31 = vpack.c.bf16 %v1759_v29, %v1758_v24  ;;  %v1524_v8 = vpop.permute.xlu1 %1523  ;;  %v1517_v30 = vpop.permute.xlu0 %1516 }
 0x1b3   :  { %v2471_v57 = vpop.eup %2470  ;;  %2295 = vmatprep.mubr.msk.f32.mxu0 %vm106_vm1, %v1318_v18  ;;  %v1279_v23 = vmul.f32 %v1263_v44, %v1215_v32  ;;  %v1240_v60 = vmul.f32 0.70710677, %v1208_v46  ;;  %v1224_v12 = vmul.f32 0.5, %v1208_v46  ;;  %v2389_v11 = vpack.c.bf16 %v1761_v33, %v1760_v19 }
 0x1b4   :  { %v2473_v42 = vpop.eup %2472  ;;  %v1266_v43 = vadd.f32 1.0, %v2471_v57  ;;  %v1239_v4 = vmul.f32 0.70710677, %v1207_v47  ;;  %v1223_v26 = vmul.f32 0.5, %v1207_v47  ;;  %2386 = vmatprep.subr.bf16.mxu0 %v2385_v31  ;;  %v1755_v36 = vsel %vm1751_vm9, %v3127_v45, 0.0 }
 0x1b5   :  { %v1265_v52 = vadd.f32 1.0, %v2473_v42  ;;  %2482 = verf.f32 %v1240_v60  ;;  %v1319_v55 = vcombine.low %v1279_v23, %v1280_v48  ;;  %2388 = vmatpush3.bf16.msra.mxu0 %v2385_v31  ;;  %v1752_v9 = vsel %vm1751_vm9, %v3122_v40, 0.0  ;;  %1756 = vadd.xlane.f32.xlu1 %v1755_v36 }
 0x1b6   :  { %v1282_v54 = vmul.f32 %v1266_v43, %v1218_v53  ;;  %2484 = verf.f32 %v1239_v4  ;;  %2390 = vmatprep.subr.bf16.mxu0 %v2389_v11  ;;  %1753 = vadd.xlane.f32.xlu0 %v1752_v9  ;;  %v3289_v40 = vpop.permute.xlu1 %1572  ;;  %v1531_v18 = vpop.permute.xlu0 %1530 }
 0x1b7   :  { %v1281_v5 = vmul.f32 %v1265_v52, %v1217_v38  ;;  %v2475_v34 = vpop.eup %2474  ;;  %2296 = vmatmul.mubr.msk.f32.gmra.mrb[4].mxu0 %vm106_vm1, %v1319_v55 }
 0x1b8   :  { %v2477_v51 = vpop.eup %2476  ;;  %v1268_v58 = vadd.f32 1.0, %v2475_v34 }
 0x1b9   :  { %v1320_v15 = vcombine.low %v1281_v5, %v1282_v54  ;;  %v1267_v16 = vadd.f32 1.0, %v2477_v51  ;;  %2392 = vmatpush3.bf16.msra.mxu0 %v2389_v11 }
 0x1ba   :  { %v1284_v59 = vmul.f32 %v1268_v58, %v1220_v56  ;;  %v1538_v48 = vpop.permute.xlu1 %1537  ;;  %v3293_v23 = vpop.permute.xlu0 %1579 }
 0x1bb   :  { %v2479_v25 = vpop.eup %2478  ;;  %2298 = vmatprep.mubr.msk.f32.mxu0 %vm106_vm1, %v1320_v15  ;;  %v1283_v61 = vmul.f32 %v1267_v16, %v1219_v49 }
 0x1bc   :  { %v2481_v50 = vpop.eup %2480  ;;  %v1270_v37 = vadd.f32 1.0, %v2479_v25 }
 0x1bd   :  { %v1269_v0 = vadd.f32 1.0, %v2481_v50  ;;  %v1321_v3 = vcombine.low %v1283_v61, %v1284_v59 }
 0x1be   :  { %v1286_v62 = vmul.f32 %v1270_v37, %v1222_v39  ;;  %v1545_v5 = vpop.permute.xlu1 %1544  ;;  %v3297_v59 = vpop.permute.xlu0 %1586 }
 0x1bf   :  { %v1285_v14 = vmul.f32 %v1269_v0, %v1221_v10  ;;  %v2483_v7 = vpop.eup %2482  ;;  %2299 = vmatmul.mubr.msk.f32.gmra.mrb[6].mxu0 %vm106_vm1, %v1321_v3 }
 0x1c0   :  { %v2485_v13 = vpop.eup %2484  ;;  %v1272_v63 = vadd.f32 1.0, %v2483_v7 }
 0x1c1   :  { %v1322_v17 = vcombine.low %v1285_v14, %v1286_v62  ;;  %v1271_v20 = vadd.f32 1.0, %v2485_v13 }
 0x1c2   :  { %v1288_v1 = vmul.f32 %v1272_v63, %v1224_v12  ;;  %v1552_v13 = vpop.permute.xlu1 %1551  ;;  %v3306_v36 = vpop.permute.xlu0 %1593 }
 0x1c3   :  { %2301 = vmatprep.mubr.msk.f32.mxu0 %vm106_vm1, %v1322_v17  ;;  %v1287_v2 = vmul.f32 %v1271_v20, %v1223_v26 }
 0x1c5   :  { %v1323_v22 = vcombine.low %v1287_v2, %v1288_v1 }
 0x1c7   :  { %2302 = vmatmul.mubr.msk.f32.gmra.mrb[8].mxu0 %vm106_vm1, %v1323_v22 }
 0x282   :  { %v2294_v41 = vpop.f32.mrb[2].mxu0 }
 0x283   :  { %v1412_v28 = vadd.f32 %v2294_v41, %v3285_v35  ;;  %v1406_v6 = vpop.f32.mrb[3].mxu0 }
 0x284   :  { %v1407_v27 = vadd.f32 %v3285_v35, %v1406_v6 }
 0x285   :  { %v1454_v21 = vmul.f32 0.70710677, %v1412_v28  ;;  %v1446_v60 = vmul.f32 0.5, %v1412_v28 }
 0x286   :  { %v1453_v45 = vmul.f32 0.70710677, %v1407_v27  ;;  %v1445_v4 = vmul.f32 0.5, %v1407_v27 }
 0x287   :  { %2486 = verf.f32 %v1454_v21 }
 0x288   :  { %2488 = verf.f32 %v1453_v45 }
 0x28a   :  { %v2297_v32 = vpop.f32.mrb[4].mxu0 }
 0x28b   :  { %v1422_v44 = vadd.f32 %v2297_v32, %v3285_v35  ;;  %v1416_v46 = vpop.f32.mrb[5].mxu0 }
 0x28c   :  { %v1417_v47 = vadd.f32 %v3285_v35, %v1416_v46  ;;  %v1559_v46 = vpop.permute.xlu1 %1558 }
 0x28d   :  { %v1456_v57 = vmul.f32 0.70710677, %v1422_v44  ;;  %v1448_v39 = vmul.f32 0.5, %v1422_v44 }
 0x28e   :  { %v1455_v42 = vmul.f32 0.70710677, %v1417_v47  ;;  %v1447_v3 = vmul.f32 0.5, %v1417_v47 }
 0x28f   :  { %2490 = verf.f32 %v1456_v57 }
 0x290   :  { %2492 = verf.f32 %v1455_v42 }
 0x291   :  { %v2487_v53 = vpop.eup %2486 }
 0x292   :  { %v2489_v43 = vpop.eup %2488  ;;  %v1470_v38 = vadd.f32 1.0, %v2487_v53  ;;  %v2300_v52 = vpop.f32.mrb[6].mxu0 }
 0x293   :  { %v1469_v54 = vadd.f32 1.0, %v2489_v43  ;;  %v1432_v55 = vadd.f32 %v2300_v52, %v3285_v35  ;;  %v1426_v34 = vpop.f32.mrb[7].mxu0 }
 0x294   :  { %v1478_v51 = vmul.f32 %v1470_v38, %v1446_v60  ;;  %v1427_v56 = vadd.f32 %v3285_v35, %v1426_v34 }
 0x295   :  { %v1477_v58 = vmul.f32 %v1469_v54, %v1445_v4  ;;  %v1458_v49 = vmul.f32 0.70710677, %v1432_v55 }
 0x296   :  { %v1494_v15 = vcombine.high %v1478_v51, %v1478_v51  ;;  %v1457_v16 = vmul.f32 0.70710677, %v1427_v56  ;;  %v1625_v25 = vmul.f32 %v1531_v18, %v1478_v51 }
 0x297   :  { %v1493_v50 = vcombine.high %v1477_v58, %v1477_v58  ;;  %v1623_v61 = vmul.f32 %v1517_v30, %v1477_v58 }
 0x298   :  { %v1626_v37 = vmul.f32 %v1538_v48, %v1494_v15  ;;  %2494 = verf.f32 %v1457_v16  ;;  %v1653_v10 = vsel %vm121_vm0, %v1625_v25, 0.0 }
 0x299   :  { %v2491_v0 = vpop.eup %2490  ;;  %v1624_v62 = vmul.f32 %v1524_v8, %v1493_v50  ;;  %v1639_v14 = vsel %vm121_vm0, %v1623_v61, 0.0  ;;  %v1654_v7 = vrot.slane %v1653_v10, 4  ;;  %2496 = verf.f32 %v1458_v49 }
 0x29a   :  { %v2493_v12 = vpop.eup %2492  ;;  %v1660_v63 = vsel %vm121_vm0, %v1626_v37, 0.0  ;;  %v1640_v17 = vrot.slane %v1639_v14, 4  ;;  %v2303_v26 = vpop.f32.mrb[8].mxu0  ;;  %v1472_v20 = vadd.f32 1.0, %v2491_v0  ;;  %v1450_v8 = vmul.f32 0.5, %v1432_v55 }
 0x29b   :  { %v1646_v1 = vsel %vm121_vm0, %v1624_v62, 0.0  ;;  %v1661_v2 = vrot.slane %v1660_v63, 4  ;;  %v1471_v22 = vadd.f32 1.0, %v2493_v12  ;;  %v1655_v24 = vadd.f32 %v1654_v7, %v1653_v10  ;;  %v1436_v29 = vpop.f32.mrb[9].mxu0  ;;  %v3312_v55 = vpop.permute.xlu0 %1600 }
 0x29c   :  { %v1647_v31 = vrot.slane %v1646_v1, 4  ;;  %v1641_v19 = vadd.f32 %v1640_v17, %v1639_v14  ;;  %v1442_v33 = vadd.f32 %v2303_v26, %v3285_v35  ;;  %v3304_v11 = vmul.f32 %v1472_v20, %v1448_v39 }
 0x29d   :  { %v1662_v9 = vadd.f32 %v1661_v2, %v1660_v63  ;;  %v1479_v41 = vmul.f32 %v1471_v22, %v1447_v3  ;;  %v1656_v28 = vrot.slane %v1655_v24, 2  ;;  %v1437_v21 = vadd.f32 %v3285_v35, %v1436_v29 }
 0x29e   :  { %v1648_v6 = vadd.f32 %v1647_v31, %v1646_v1  ;;  %v1642_v27 = vrot.slane %v1641_v19, 2  ;;  %v1460_v30 = vmul.f32 0.70710677, %v1442_v33  ;;  %v1629_v48 = vmul.f32 %v1559_v46, %v3304_v11 }
 0x29f   :  { %v1663_v45 = vrot.slane %v1662_v9, 2  ;;  %v1627_v32 = vmul.f32 %v1545_v5, %v1479_v41  ;;  %v1657_v18 = vadd.f32 %v1656_v28, %v1655_v24  ;;  %v1495_v44 = vcombine.high %v1479_v41, %v1479_v41  ;;  %v3317_v20 = vpop.permute.xlu0 %1607 }
 0x2a0   :  { %v1649_v47 = vrot.slane %v1648_v6, 2  ;;  %v1643_v57 = vadd.f32 %v1642_v27, %v1641_v19  ;;  %2498 = verf.f32 %v1460_v30  ;;  %v1681_v35 = vsel %vm121_vm0, %v1629_v48, 0.0 }
 0x2a1   :  { %v1664_v42 = vadd.f32 %v1663_v45, %v1662_v9  ;;  %v1667_v53 = vsel %vm121_vm0, %v1627_v32, 0.0  ;;  %v1658_v43 = vrot.slane %v1657_v18, 1  ;;  %v1628_v60 = vmul.f32 %v1552_v13, %v1495_v44  ;;  %v1566_v9 = vpop.permute.xlu1 %1565 }
 0x2a2   :  { %v2495_v38 = vpop.eup %2494  ;;  %v1650_v52 = vadd.f32 %v1649_v47, %v1648_v6  ;;  %v1644_v4 = vrot.slane %v1643_v57, 1  ;;  %v1668_v54 = vrot.slane %v1667_v53, 4  ;;  %v1449_v5 = vmul.f32 0.5, %v1427_v56 }
 0x2a3   :  { %v1473_v34 = vadd.f32 1.0, %v2495_v38  ;;  %v1674_v51 = vsel %vm121_vm0, %v1628_v60, 0.0  ;;  %v1452_v58 = vmul.f32 0.5, %v1442_v33  ;;  %v2497_v15 = vpop.eup %2496  ;;  %v1665_v16 = vrot.slane %v1664_v42, 1 }
 0x2a4   :  { %v1651_v49 = vrot.slane %v1650_v52, 1  ;;  %v1669_v25 = vadd.f32 %v1668_v54, %v1667_v53  ;;  %v1675_v50 = vrot.slane %v1674_v51, 4  ;;  %v1645_v61 = vadd.f32 %v1644_v4, %v1643_v57 }
 0x2a5   :  { %v1659_v39 = vadd.f32 %v1658_v43, %v1657_v18  ;;  %v1481_v37 = vmul.f32 %v1473_v34, %v1449_v5  ;;  %v1682_v10 = vrot.slane %v1681_v35, 4  ;;  %v1459_v14 = vmul.f32 0.70710677, %v1437_v21  ;;  %v1615_v43 = vpop.permute.xlu0 %1614 }
 0x2a6   :  { %v1652_v0 = vadd.f32 %v1651_v49, %v1650_v52  ;;  %v1670_v62 = vrot.slane %v1669_v25, 2  ;;  %v1676_v3 = vadd.f32 %v1675_v50, %v1674_v51  ;;  %v1474_v12 = vadd.f32 1.0, %v2497_v15 }
 0x2a7   :  { %v1497_v7 = vcombine.high %v1481_v37, %v1481_v37  ;;  %v1631_v56 = vmul.f32 %v3289_v40, %v1481_v37  ;;  %v1683_v13 = vadd.f32 %v1682_v10, %v1681_v35  ;;  %2500 = verf.f32 %v1459_v14  ;;  %v1622_v35 = vpop.permute.xlu1 %1621 }
 0x2a8   :  { %v1787_v63 = vsel %vm316_vm2, %v1652_v0, %v1645_v61  ;;  %v1671_v17 = vadd.f32 %v1670_v62, %v1669_v25  ;;  %v1677_v26 = vrot.slane %v1676_v3, 2  ;;  %v1482_v33 = vmul.f32 %v1474_v12, %v1450_v8 }
 0x2a9   :  { %v1788_v1 = vsel %vm318_vm3, %v1659_v39, %v1787_v63  ;;  %v1695_v2 = vsel %vm121_vm0, %v1631_v56, 0.0  ;;  %v1632_v22 = vmul.f32 %v3293_v23, %v1497_v7  ;;  %v1684_v24 = vrot.slane %v1683_v13, 2 }
 0x2aa   :  { %v2499_v29 = vpop.eup %2498  ;;  %v1672_v31 = vrot.slane %v1671_v17, 1  ;;  %v1678_v19 = vadd.f32 %v1677_v26, %v1676_v3  ;;  %v1696_v40 = vrot.slane %v1695_v2, 4  ;;  %v1496_v6 = vcombine.high %v3304_v11, %v3304_v11 }
 0x2ab   :  { %v1702_v41 = vsel %vm121_vm0, %v1632_v22, 0.0  ;;  %v1685_v28 = vadd.f32 %v1684_v24, %v1683_v13  ;;  %v1476_v27 = vadd.f32 1.0, %v2499_v29  ;;  %v1666_v30 = vadd.f32 %v1665_v16, %v1664_v42 }
 0x2ac   :  { %v1697_v45 = vadd.f32 %v1696_v40, %v1695_v2  ;;  %v1703_v32 = vrot.slane %v1702_v41, 4  ;;  %v1451_v18 = vmul.f32 0.5, %v1437_v21  ;;  %v1673_v44 = vadd.f32 %v1672_v31, %v1671_v17 }
 0x2ad   :  { %v1633_v23 = vmul.f32 %v3297_v59, %v1482_v33  ;;  %v1630_v46 = vmul.f32 %v1566_v9, %v1496_v6  ;;  %v1498_v47 = vcombine.high %v1482_v33, %v1482_v33  ;;  %v1679_v57 = vrot.slane %v1678_v19, 1 }
 0x2ae   :  { %v1698_v48 = vrot.slane %v1697_v45, 2  ;;  %v1704_v8 = vadd.f32 %v1703_v32, %v1702_v41  ;;  %v1484_v53 = vmul.f32 %v1476_v27, %v1452_v58  ;;  %v1686_v60 = vrot.slane %v1685_v28, 1 }
 0x2af   :  { %v1709_v38 = vsel %vm121_vm0, %v1633_v23, 0.0  ;;  %v1688_v11 = vsel %vm121_vm0, %v1630_v46, 0.0  ;;  %v1634_v42 = vmul.f32 %v3306_v36, %v1498_v47  ;;  %v1789_v51 = vsel %vm320_vm4, %v1666_v30, %v1788_v1 }
 0x2b0   :  { %v1699_v52 = vadd.f32 %v1698_v48, %v1697_v45  ;;  %v1705_v4 = vrot.slane %v1704_v8, 2  ;;  %v1710_v21 = vrot.slane %v1709_v38, 4  ;;  %v1689_v54 = vrot.slane %v1688_v11, 4 }
 0x2b1   :  { %v1716_v59 = vsel %vm121_vm0, %v1634_v42, 0.0  ;;  %v1637_v5 = vmul.f32 %v1615_v43, %v1484_v53  ;;  %v1500_v34 = vcombine.high %v1484_v53, %v1484_v53  ;;  %v2501_v58 = vpop.eup %2500  ;;  %v1680_v24 = vadd.f32 %v1679_v57, %v1678_v19 }
 0x2b2   :  { %v1700_v15 = vrot.slane %v1699_v52, 1  ;;  %v1706_v49 = vadd.f32 %v1705_v4, %v1704_v8  ;;  %v1711_v16 = vadd.f32 %v1710_v21, %v1709_v38  ;;  %v1690_v25 = vadd.f32 %v1689_v54, %v1688_v11 }
 0x2b3   :  { %v1717_v50 = vrot.slane %v1716_v59, 4  ;;  %v1475_v61 = vadd.f32 1.0, %v2501_v58  ;;  %v1737_v36 = vsel %vm121_vm0, %v1637_v5, 0.0  ;;  %v1638_v39 = vmul.f32 %v1622_v35, %v1500_v34 }
 0x2b4   :  { %v1701_v37 = vadd.f32 %v1700_v15, %v1699_v52  ;;  %v1707_v10 = vrot.slane %v1706_v49, 1  ;;  %v1712_v0 = vrot.slane %v1711_v16, 2  ;;  %v1691_v62 = vrot.slane %v1690_v25, 2 }
 0x2b5   :  { %v1718_v3 = vadd.f32 %v1717_v50, %v1716_v59  ;;  %v1483_v14 = vmul.f32 %v1475_v61, %v1451_v18  ;;  %v1738_v7 = vrot.slane %v1737_v36, 4  ;;  %v1744_v56 = vsel %vm121_vm0, %v1638_v39, 0.0  ;;  %v2184_v50 = vld [vmem:[%s3463_s11] ss:$0 sm:$0xff]  ;;  %v1757_v61 = vpop.xlane.xlu1 %1756 }
 0x2b6   :  { %v1708_v13 = vadd.f32 %v1707_v10, %v1706_v49  ;;  %v1713_v12 = vadd.f32 %v1712_v0, %v1711_v16  ;;  %v1692_v63 = vadd.f32 %v1691_v62, %v1690_v25  ;;  %v1745_v17 = vrot.slane %v1744_v56, 4 }
 0x2b7   :  { %v1719_v26 = vrot.slane %v1718_v3, 2  ;;  %v1635_v1 = vmul.f32 %v3312_v55, %v1483_v14  ;;  %v1499_v2 = vcombine.high %v1483_v14, %v1483_v14  ;;  %v1739_v22 = vadd.f32 %v1738_v7, %v1737_v36  ;;  %v1754_v36 = vpop.xlane.xlu0 %1753  ;;  %v2510_v14 = vld [vmem:[#allocation2] sm:$0xff] }
 0x2b8   :  { %v1794_v29 = vsel %vm316_vm2, %v1708_v13, %v1701_v37  ;;  %v1714_v31 = vrot.slane %v1713_v12, 1  ;;  %v1746_v40 = vadd.f32 %v1745_v17, %v1744_v56  ;;  %v1693_v33 = vrot.slane %v1692_v63, 1  ;;  %v2511_v56 = vld [vmem:[#allocation2 + $0x8] sm:$0xff] }
 0x2b9   :  { %v1720_v9 = vadd.f32 %v1719_v26, %v1718_v3  ;;  %v1723_v41 = vsel %vm121_vm0, %v1635_v1, 0.0  ;;  %v1636_v6 = vmul.f32 %v3317_v20, %v1499_v2  ;;  %v1687_v27 = vadd.f32 %v1686_v60, %v1685_v28 }
 0x2ba   :  { %v1715_v30 = vadd.f32 %v1714_v31, %v1713_v12  ;;  %v1724_v45 = vrot.slane %v1723_v41, 4  ;;  %v1740_v55 = vrot.slane %v1739_v22, 2  ;;  %v1790_v23 = vsel %vm322_vm5, %v1673_v44, %v1789_v51 }
 0x2bb   :  { %v1721_v32 = vrot.slane %v1720_v9, 1  ;;  %v1730_v18 = vsel %vm121_vm0, %v1636_v6, 0.0  ;;  %v1747_v57 = vrot.slane %v1746_v40, 2  ;;  %v1694_v48 = vadd.f32 %v1693_v33, %v1692_v63  ;;  %v1929_v6 = vld [vmem:[#allocation5 + $0x10] sm:$0xff] }
 0x2bc   :  { %v1795_v19 = vsel %vm318_vm3, %v1715_v30, %v1794_v29  ;;  %v1725_v46 = vadd.f32 %v1724_v45, %v1723_v41  ;;  %v1731_v47 = vrot.slane %v1730_v18, 4  ;;  %v1791_v53 = vsel %vm324_vm6, %v1680_v24, %v1790_v23  ;;  %v1928_v41 = vld [vmem:[#allocation5 + $0x8] sm:$0xff]  ;;  %v1930_v30 = vld [vmem:[#allocation5 + $0x18] sm:$0xff] }
 0x2bd   :  { %v1722_v8 = vadd.f32 %v1721_v32, %v1720_v9  ;;  %v1792_v28 = vsel %vm326_vm7, %v1687_v27, %v1791_v53  ;;  %v1741_v38 = vadd.f32 %v1740_v55, %v1739_v22  ;;  %v1748_v52 = vadd.f32 %v1747_v57, %v1746_v40  ;;  %v1927_v9 = vld [vmem:[#allocation5] sm:$0xff]  ;;  %v2029_v32 = vld [vmem:[%s3468_s16] sm:$0xff]  ;;  %v2034_v57 = vld [vmem:[%s3468_s16 + $0x28] sm:$0xff] }
 0x2be   :  { %v1726_v43 = vrot.slane %v1725_v46, 2  ;;  %v1732_v20 = vadd.f32 %v1731_v47, %v1730_v18  ;;  %v1793_v11 = vsel %vm328_vm8, %v1694_v48, %v1792_v28  ;;  %v1770_v39 = vmul.f32 %v2184_v50, %v1757_v61  ;;  %v2030_v18 = vld [vmem:[%s3468_s16 + $0x8] sm:$0xff]  ;;  %v2031_v55 = vld [vmem:[%s3468_s16 + $0x10] sm:$0xff]  ;;  %v2033_v47 = vld [vmem:[%s3468_s16 + $0x20] sm:$0xff] }
 0x2bf   :  { %v1796_v60 = vsel %vm320_vm4, %v1722_v8, %v1795_v19  ;;  %2312 = vmatprep.mubr.msk.f32.mxu0 %vm106_vm1, %v1793_v11  ;;  %v1742_v54 = vrot.slane %v1741_v38, 1  ;;  %v1749_v5 = vrot.slane %v1748_v52, 1  ;;  %v1769_v37 = vmul.f32 %v2184_v50, %v1754_v36  ;;  %v2032_v19 = vld [vmem:[%s3468_s16 + $0x18] sm:$0xff]  ;;  %v2187_v11 = vld [vmem:[%s3464_s12] ss:$0 sm:$0xff]  ;;  %v2042_v36 = vld [vmem:[%s3468_s16 + $0x68] sm:$0xff] }
 0x2c0   :  { %v1727_v42 = vadd.f32 %v1726_v43, %v1725_v46  ;;  %v1733_v44 = vrot.slane %v1732_v20, 2  ;;  %v2393_v27 = vpack.c.bf16 %v1928_v41, %v1927_v9  ;;  %v2397_v45 = vpack.c.bf16 %v1930_v30, %v1929_v6  ;;  %v2041_v61 = vld [vmem:[%s3468_s16 + $0x60] sm:$0xff] }
 0x2c1   :  { %v1743_v58 = vadd.f32 %v1742_v54, %v1741_v38  ;;  %v1750_v49 = vadd.f32 %v1749_v5, %v1748_v52  ;;  %v2401_v23 = vpack.c.bf16 %v2030_v18, %v2029_v32  ;;  %v2405_v46 = vpack.c.bf16 %v2032_v19, %v2031_v55  ;;  %v2035_v5 = vld [vmem:[%s3468_s16 + $0x30] sm:$0xff]  ;;  %v2192_v6 = vld [vmem:[%s3469_s17] ss:$0 sm:$0xff]  ;;  %s2556_s17 = scalar_lea.vmem %s2151_s19, 256 }
 0x2c2   :  { %v1728_v4 = vrot.slane %v1727_v42, 1  ;;  %v1734_v21 = vadd.f32 %v1733_v44, %v1732_v20  ;;  %2394 = vmatprep.subr.bf16.mxu0 %v2393_v27  ;;  %v2409_v48 = vpack.c.bf16 %v2034_v57, %v2033_v47  ;;  %v2188_v44 = vld [vmem:[%s3465_s13] ss:$0 sm:$0xff]  ;;  %p2557_p2 = scmp.ne.s32.totalorder %s2151_s19, %s2556_s17  ;;  %p2562_p4 = scmp.lt.s32.totalorder %s2556_s17, %s2556_s17 }
 0x2c3   :  { %2402 = vmatprep.subr.bf16.mxu1 %v2401_v23 }
 0x2c4   :  { %v1729_v35 = vadd.f32 %v1728_v4, %v1727_v42  ;;  %v1735_v59 = vrot.slane %v1734_v21, 1  ;;  %2404 = vmatpush3.bf16.msra.mxu1 %v2401_v23  ;;  %p2563_p5 = por %p2562_p4, %p2561_p3 }
 0x2c5   :  { %2406 = vmatprep.subr.bf16.mxu1 %v2405_v46 }
 0x2c6   :  { %v1797_v34 = vsel %vm322_vm5, %v1729_v35, %v1796_v60  ;;  %v1736_v51 = vadd.f32 %v1735_v59, %v1734_v21  ;;  %p2564_p6 = pnand %p2563_p5, %p2557_p2 }
 0x2c8   :  { %v1798_v15 = vsel %vm324_vm6, %v1736_v51, %v1797_v34  ;;  %2408 = vmatpush3.bf16.msra.mxu1 %v2405_v46  ;;  %v2036_v34 = vld [vmem:[%s3468_s16 + $0x38] sm:$0xff] }
 0x2c9   :  { %v1799_v16 = vsel %vm326_vm7, %v1743_v58, %v1798_v15  ;;  %2410 = vmatprep.subr.bf16.mxu1 %v2409_v48  ;;  %v2413_v51 = vpack.c.bf16 %v2036_v34, %v2035_v5  ;;  %v2037_v58 = vld [vmem:[%s3468_s16 + $0x40] sm:$0xff]  ;;  %v2038_v15 = vld [vmem:[%s3468_s16 + $0x48] sm:$0xff] }
 0x2ca   :  { %v1800_v25 = vsel %vm328_vm8, %v1750_v49, %v1799_v16  ;;  %v2417_v49 = vpack.c.bf16 %v2038_v15, %v2037_v58  ;;  %v2039_v16 = vld [vmem:[%s3468_s16 + $0x50] sm:$0xff] }
 0x2cb   :  { %2313 = vmatmul.mubr.msk.f32.vlgmr.msra.gmra.mrb[10].mxu0 %vm106_vm1, %v1800_v25  ;;  %v2040_v25 = vld [vmem:[%s3468_s16 + $0x58] sm:$0xff] }
 0x2cc   :  { %2396 = vmatpush3.bf16.msra.mxu0 %v2393_v27  ;;  %2412 = vmatpush3.bf16.msra.mxu1 %v2409_v48  ;;  %v2421_v50 = vpack.c.bf16 %v2040_v25, %v2039_v16 }
 0x2cd   :  { %2398 = vmatprep.subr.bf16.mxu0 %v2397_v45  ;;  %2414 = vmatprep.subr.bf16.mxu1 %v2413_v51 }
 0x2d0   :  { %2400 = vmatpush3.bf16.msra.mxu0 %v2397_v45  ;;  %2416 = vmatpush3.bf16.msra.mxu1 %v2413_v51 }
 0x2d1   :  { %2418 = vmatprep.subr.bf16.mxu1 %v2417_v49 }
 0x2d4   :  { %2420 = vmatpush3.bf16.msra.mxu1 %v2417_v49 }
 0x2d5   :  { %2422 = vmatprep.subr.bf16.mxu1 %v2421_v50 }
 0x2d8   :  { %2424 = vmatpush3.bf16.msra.mxu1 %v2421_v50 }
 0x39e   :  { %v2314_v10 = vpop.f32.mrb[10].mxu0 }
 0x39f   :  { %v1871_v0 = vpop.f32.mrb[11].mxu0  ;;  %v1877_v62 = vadd.f32 %v2314_v10, %v1770_v39  ;;  %v2425_v39 = vpack.c.bf16 %v2042_v36, %v2041_v61  ;;  %v2044_v10 = vld [vmem:[%s3468_s16 + $0x78] sm:$0xff] }
 0x3a0   :  { %v1872_v3 = vadd.f32 %v1871_v0, %v1769_v37  ;;  %v2043_v37 = vld [vmem:[%s3468_s16 + $0x70] sm:$0xff] }
 0x3a1   :  { %v3355_v13 = vadd.f32 %v2511_v56, %v1877_v62  ;;  %2426 = vmatprep.subr.bf16.mxu1 %v2425_v39  ;;  %v2429_v0 = vpack.c.bf16 %v2044_v10, %v2043_v37  ;;  %v2130_v62 = vld [vmem:[%s3455_s3 + $0x8] sm:$0xff]  ;;  %v2189_v56 = vld [vmem:[%s3467_s15] ss:$0 sm:$0xff] }
 0x3a2   :  { %v3353_v7 = vadd.f32 %v2510_v14, %v1872_v3  ;;  %2428 = vmatpush3.bf16.msra.mxu1 %v2425_v39  ;;  %v2129_v3 = vld [vmem:[%s3455_s3] sm:$0xff]  ;;  %v2589_v14 = vmov 0  }
 0x3a3   :  { %v1887_v63 = vsel %vm106_vm1, %v3355_v13, 0.0  ;;  %2430 = vmatprep.subr.bf16.mxu1 %v2429_v0  ;;  %2441 = vset.pattern.permute.xlu1 %v2589_v14 }
 0x3a4   :  { %v1884_v12 = vsel %vm106_vm1, %v3353_v7, 0.0  ;;  %2440 = vset.pattern.permute.xlu0 %v2589_v14 }
 0x3a5   :  { %1885 = vadd.xlane.f32.xlu0 %v1884_v12 }
 0x3a6   :  { %2432 = vmatpush3.bf16.msra.mxu1 %v2429_v0 }
 0x3a9   :  { %1888 = vadd.xlane.f32.xlu0 %v1887_v63 }
 0x432   :  { %v1886_v17 = vpop.xlane.xlu0 %1885 }
 0x433   :  { %v1891_v26 = vmul.f32 0.03125, %v1886_v17 }
 0x435   :  { %v1893_v1 = vsub.f32 %v3353_v7, %v1891_v26 }
 0x436   :  { %v1889_v2 = vpop.xlane.xlu0 %1888 }
 0x437   :  { %v1892_v22 = vmul.f32 0.03125, %v1889_v2  ;;  %v1895_v24 = vmul.f32 %v1893_v1, %v1893_v1 }
 0x439   :  { %v1894_v29 = vsub.f32 %v3355_v13, %v1892_v22  ;;  %v1897_v31 = vsel %vm106_vm1, %v1895_v24, 0.0 }
 0x43a   :  { %1898 = vadd.xlane.f32.xlu0 %v1897_v31 }
 0x43b   :  { %v1896_v40 = vmul.f32 %v1894_v29, %v1894_v29 }
 0x43d   :  { %v1900_v33 = vsel %vm106_vm1, %v1896_v40, 0.0 }
 0x43e   :  { %1901 = vadd.xlane.f32.xlu1 %v1900_v33 }
 0x44f   :  { %2138 = vperm.xlu1 %2441, %v2130_v62  }
 0x450   :  { %2133 = vperm.xlu0 %2440, %v2129_v3  }
 0x4c7   :  { %v1899_v8 = vpop.xlane.xlu0 %1898 }
 0x4c8   :  { %v1903_v53 = vmul.f32 0.03125, %v1899_v8 }
 0x4ca   :  { %v1905_v43 = vadd.f32 1e-05, %v1903_v53 }
 0x4cb   :  { %v1902_v20 = vpop.xlane.xlu1 %1901 }
 0x4cc   :  { %2502 = vrsqrt.f32 %v1905_v43  ;;  %v1904_v28 = vmul.f32 0.03125, %v1902_v20 }
 0x4ce   :  { %v1906_v60 = vadd.f32 1e-05, %v1904_v28 }
 0x4cf   :  { %v2139_v18 = vpop.permute.xlu1 %2138  ;;  %v2134_v23 = vpop.permute.xlu0 %2133 }
 0x4d0   :  { %2504 = vrsqrt.f32 %v1906_v60 }
 0x4d6   :  { %v2503_v38 = vpop.eup %2502 }
 0x4d7   :  { %v1909_v42 = vmul.f32 %v2503_v38, %v1893_v1 }
 0x4d9   :  { %v1917_v52 = vmul.f32 %v2187_v11, %v1909_v42 }
 0x4da   :  { %v2505_v4 = vpop.eup %2504 }
 0x4db   :  { %v1910_v21 = vmul.f32 %v2505_v4, %v1894_v29  ;;  %v1925_v54 = vadd.f32 %v2188_v44, %v1917_v52 }
 0x4dd   :  { %v1918_v35 = vmul.f32 %v2187_v11, %v1910_v21  ;;  %2323 = vmatprep.mubr.msk.f32.mxu0 %vm106_vm1, %v1925_v54 }
 0x4df   :  { %v1926_v59 = vadd.f32 %v2188_v44, %v1918_v35 }
 0x4e1   :  { %2324 = vmatmul.mubr.msk.f32.vlgmr.msra.gmra.mrb[12].mxu0 %vm106_vm1, %v1926_v59 }
 0x5b4   :  { %v2325_v12 = vpop.f32.mrb[12].mxu0 }
 0x5b5   :  { %v2016_v63 = vadd.f32 %v2325_v12, %v2189_v56  ;;  %v2010_v17 = vpop.f32.mrb[13].mxu0 }
 0x5b6   :  { %v2011_v26 = vadd.f32 %v2189_v56, %v2010_v17 }
 0x5b7   :  { %v2022_v1 = vmul.f32 0.70710677, %v2016_v63  ;;  %v2020_v33 = vmul.f32 0.5, %v2016_v63 }
 0x5b8   :  { %v2021_v2 = vmul.f32 0.70710677, %v2011_v26  ;;  %v2019_v31 = vmul.f32 0.5, %v2011_v26 }
 0x5b9   :  { %2506 = verf.f32 %v2022_v1 }
 0x5ba   :  { %2508 = verf.f32 %v2021_v2 }
 0x5c3   :  { %v2507_v22 = vpop.eup %2506 }
 0x5c4   :  { %v2509_v24 = vpop.eup %2508  ;;  %v2026_v29 = vadd.f32 1.0, %v2507_v22 }
 0x5c5   :  { %v2025_v40 = vadd.f32 1.0, %v2509_v24 }
 0x5c6   :  { %v2028_v41 = vmul.f32 %v2026_v29, %v2020_v33 }
 0x5c7   :  { %v2027_v9 = vmul.f32 %v2025_v40, %v2019_v31 }
 0x5c9   :  { %2358 = vmatprep.mubr.f32.mxu1 %v2027_v9 }
 0x5ca   :  { %2359 = vmatmul.mubr.f32.vlgmr.msra.gmra.mrb[8].mxu1 %v2028_v41 }
 0x69d   :  { %v2360_v27 = vpop.f32.mrb[8].mxu1 }
 0x69e   :  { %v2124_v30 = vadd.f32 %v2360_v27, %v2192_v6  ;;  %v2118_v45 = vpop.f32.mrb[9].mxu1 }
 0x69f   :  { %v2119_v32 = vadd.f32 %v2192_v6, %v2118_v45 }
 0x6a0   :  { %v2128_v55 = vadd.f32 %v2124_v30, %v3355_v13 }
 0x6a1   :  { %v2127_v19 = vadd.f32 %v2119_v32, %v3353_v7 }
 0x6a2   :  { %v2142_v46 = vmul.f32 %v2139_v18, %v2128_v55 }
 0x6a3   :  { %v2141_v47 = vmul.f32 %v2134_v23, %v2127_v19 }
 0x6a4   :  { %2144 = vst.msk [vmem:[#allocation7 + $0x8] sm:$0xff] %vm106_vm1, %v2142_v46 }
 0x6a5   :  { %2143 = vst.msk [vmem:[#allocation7] sm:$0xff] %vm106_vm1, %v2141_v47 }
 0x6a6   :  { %2567 = shalt.err (!%p2564_p6)
}
 0x6a7   :  { %s3482_s13 = sld [smem:[#allocation14_spill]] }
 0x6ad   :  { %s2568_s14 = scalar_lea.hbm %s3482_s13, 256 }
 0x6ae   :  { %p2569_p7 = scmp.ne.s32.totalorder %s3482_s13, %s2568_s14  ;;  %p2572_p8 = scmp.lt.u32.totalorder %s2568_s14, %s3482_s13 }
 0x6b0   :  { %p2574_p9 = pnand %p2572_p8, %p2569_p7 }
 0x6b2   :  { %2577 = shalt.err (!%p2574_p9)
}
 0x6b3   :  { %2156 = dma.vmem_to_hbm [thread:$0]  %s2151_s19, 256, %s3482_s13, [#allocation4], %s2585_s23, %s2585_s23, %s2586_s24  }
 0x6b4   :  { %2582 = dma.done.wait [#allocation4], 256  }
 0x6b5   :  { %2583 = vsyncadd [#allocation4], 4294967040 }
 0x6b6   :  { %2160 = vsyncpa [#allocation3], 1 }
 0x6b7   :  { %2161 = vsyncpa [#allocation6], 1 }
 0x6b8   :  { %2162 = vsyncpa [#allocation4], 1 }

</bundles_post_ra>
